<compile_context>
chip_gen: v7x
topology: tpu7x:2x2x1
jax: 0.10.0
libtpu: 0.0.40
codegen_flags: <defaults>
</compile_context>

<pallas_src>
import functools
import math

import jax
import jax.numpy as jnp
import numpy as np
from jax.experimental import pallas as pl
from jax.experimental.pallas import tpu as pltpu


# ----------------------------- shared math helpers ----------------------------- #
def _layernorm(x, gamma, beta, eps=1e-5):
    mu = jnp.mean(x, axis=-1, keepdims=True)
    var = jnp.mean((x - mu) ** 2, axis=-1, keepdims=True)
    return (x - mu) * jax.lax.rsqrt(var + eps) * gamma + beta


def _l2norm(x, eps=1e-12):
    # F.normalize(dim=-1): x / max(||x||, eps)  ==  x * rsqrt(max(||x||^2, eps^2))
    ss = jnp.sum(x * x, axis=-1, keepdims=True)
    return x * jax.lax.rsqrt(jnp.maximum(ss, eps * eps))


# --------------------------------- Pallas kernel -------------------------------- #
def setfsl_kernel(sp_ref, xq_ref, agg_ref, wq_ref, gamma_ref, beta_ref,
                  qn_ref, protos_ref, *, scale):
    sp = sp_ref[...]          # [NP, D]     shared support patch tokens (attention query)
    xq = xq_ref[...]          # [QB, S, D]  this step's query-image tokens (attention k/v)
    agg = agg_ref[...]        # [NWAY, NP]  pooling + shot-averaging matrix
    wq = wq_ref[...]          # [QB, 1, S]  query patch weights (0 in the CLS slot)
    gamma = gamma_ref[...]    # [1, D]
    beta = beta_ref[...]      # [1, D]
    QB = xq.shape[0]

    # one small materialized broadcast per step; reused by matmul + residual add
    sp_b = jnp.broadcast_to(sp[None], (QB,) + sp.shape)                      # [QB, NP, D]

    # --- cross attention (q/k/v/o identity) + residual; contract last dims, no .T ---
    scores = jnp.einsum('qpd,qsd->qps', sp_b, xq,
                        preferred_element_type=jnp.float32) * scale          # [QB, NP, S]
    m = jnp.max(scores, axis=-1, keepdims=True)
    e = jnp.exp(scores - m)
    p = e * pl.reciprocal(jnp.sum(e, axis=-1, keepdims=True), approx=True)
    attn_out = jnp.einsum('qps,qsd->qpd', p, xq,
                          preferred_element_type=jnp.float32)                # [QB, NP, D]
    ctx = sp_b + attn_out                                                    # x = q + x

    # --- LayerNorm + attention-weighted pooling + shot averaging (one matmul) ---
    ctx_n = _layernorm(ctx, gamma, beta)                                     # [QB, NP, D]
    agg_b = jnp.broadcast_to(agg[None], (QB,) + agg.shape)                   # [QB, NWAY, NP]
    protos = jnp.einsum('qwp,qpd->qwd', agg_b, ctx_n,
                        preferred_element_type=jnp.float32)                  # [QB, NWAY, D]

    # --- query branch: LayerNorm all tokens, zero-padded CLS weight (no ragged slice) ---
    kv_n = _layernorm(xq, gamma, beta)                                       # [QB, S, D]
    qvec = jnp.einsum('qos,qsd->qod', wq, kv_n,
                      preferred_element_type=jnp.float32)                    # [QB, 1, D]

    # lane-dense (D on lanes) normalized outputs; the 5-wide cosine dot stays in JAX glue
    protos_ref[...] = _l2norm(protos)
    qn_ref[...] = _l2norm(qvec)


def setfsl_logits(sp, xq, agg, wq_full, gamma, beta, temperature,
                  queries_per_step=2):
    """sp: [Ns*P, D], xq: [Nq, S, D], agg: [NWAY, Ns*P], wq_full: [Nq, S] (CLS slot = 0)."""
    Nq, S, D = xq.shape
    NP = sp.shape[0]
    NWAY = agg.shape[0]
    QB = queries_per_step if (Nq % queries_per_step == 0) else 1

    kernel = functools.partial(setfsl_kernel, scale=1.0 / math.sqrt(D))
    qn, protos = pl.pallas_call(
        kernel,
        out_shape=(jax.ShapeDtypeStruct((Nq, 1, D), jnp.float32),
                   jax.ShapeDtypeStruct((Nq, NWAY, D), jnp.float32)),
        grid_spec=pltpu.PrefetchScalarGridSpec(
            num_scalar_prefetch=0,
            grid=(Nq // QB,),
            in_specs=[
                pl.BlockSpec((NP, D), lambda i: (0, 0)),        # support patches (VMEM-resident)
                pl.BlockSpec((QB, S, D), lambda i: (i, 0, 0)),  # per-step query tokens
                pl.BlockSpec((NWAY, NP), lambda i: (0, 0)),     # pooling/averaging matrix (resident)
                pl.BlockSpec((QB, 1, S), lambda i: (i, 0, 0)),  # per-step attn weights (CLS = 0)
                pl.BlockSpec((1, D), lambda i: (0, 0)),         # LayerNorm gamma (resident)
                pl.BlockSpec((1, D), lambda i: (0, 0)),         # LayerNorm beta (resident)
            ],
            out_specs=[
                pl.BlockSpec((QB, 1, D), lambda i: (i, 0, 0)),      # normalized query vectors
                pl.BlockSpec((QB, NWAY, D), lambda i: (i, 0, 0)),   # normalized prototypes
            ],
        ),
        compiler_params=pltpu.CompilerParams(dimension_semantics=("parallel",)),
    )(sp, xq, agg, wq_full[:, None, :], gamma, beta)

    # tiny 5-wide cosine distance + temperature scaling in plain JAX
    logits = jnp.einsum('bod,bwd->bow', qn, protos).reshape(Nq, NWAY) / temperature
    return logits


# ----------------------------- module forward (wrapper) ----------------------------- #
def setfsl_forward(x_support_layer, x_query_layer, support_attn, query_attn,
                   y_query, gamma, beta, temperature, num_patches):
    """Mirrors SETFSL.forward after the (external) encoder, continual_layers=None."""
    Ns, S, D = x_support_layer.shape
    Nq = x_query_layer.shape[0]
    P = num_patches
    shots = Ns // 5
    nway = 5

    # x_support[layer][:, 1:, :].reshape(-1, D)  (repeat across queries happens in-kernel)
    sp = x_support_layer[:, 1:, :].reshape(-1, D).astype(jnp.float32)

    # attn_weighted_sum weights: head mean, CLS row, drop CLS col, renormalize (glue)
    ws = support_attn.mean(axis=1)[:, 0, 1:]
    ws = ws / ws.sum(axis=-1, keepdims=True)                      # [Ns, P]
    wq = query_attn.mean(axis=1)[:, 0, 1:]
    wq = wq / wq.sum(axis=-1, keepdims=True)                      # [Nq, P]
    # zero-pad the CLS slot so the kernel can contract over the full [S, D] tile
    wq_full = jnp.concatenate([jnp.zeros((Nq, 1), jnp.float32), wq], axis=1)  # [Nq, S]

    # fold weighted pooling + per-class shot mean into one [NWAY, Ns*P] matrix
    agg = jnp.zeros((nway, Ns, P), dtype=jnp.float32)
    cls = jnp.arange(Ns) // shots
    agg = agg.at[cls, jnp.arange(Ns), :].set(ws / shots)
    agg = agg.reshape(nway, Ns * P)

    logits = setfsl_logits(sp, x_query_layer.astype(jnp.float32), agg,
                           wq_full, gamma, beta, temperature)

    # F.cross_entropy (mean reduction), single task
    logp = jax.nn.log_softmax(logits, axis=-1)
    loss = -jnp.mean(jnp.take_along_axis(logp, y_query[:, None], axis=-1))
    return loss, logits


# --------------------------------- pure-JAX reference --------------------------------- #
def setfsl_reference(x_support_layer, x_query_layer, support_attn, query_attn,
                     y_query, gamma, beta, temperature, num_patches):
    Ns, S, D = x_support_layer.shape
    Nq = x_query_layer.shape[0]
    P = num_patches
    shots = Ns // 5
    sp = x_support_layer[:, 1:, :].reshape(-1, D)
    sp_rep = jnp.broadcast_to(sp[None], (Nq, Ns * P, D))
    scale = 1.0 / math.sqrt(D)
    scores = jnp.einsum('bqd,bkd->bqk', sp_rep, x_query_layer) * scale
    attn = jax.nn.softmax(scores, axis=-1)
    z = jnp.einsum('bqk,bkd->bqd', attn, x_query_layer)
    ctx = sp_rep + z
    ctx_n = _layernorm(ctx, gamma, beta).reshape(-1, P, D)          # [Nq*Ns, P, D]
    xq_n = _layernorm(x_query_layer, gamma, beta)
    ws = support_attn.mean(axis=1)[:, 0, 1:]
    ws = ws / ws.sum(axis=-1, keepdims=True)
    ws_rep = jnp.tile(ws, (Nq, 1))
    wsum = jnp.sum(ctx_n * ws_rep[:, :, None], axis=1)              # [Nq*Ns, D]
    protos = wsum.reshape(Nq, 5, shots, D).mean(axis=2)
    wq = query_attn.mean(axis=1)[:, 0, 1:]
    wq = wq / wq.sum(axis=-1, keepdims=True)
    qv = jnp.sum(xq_n[:, 1:, :] * wq[:, :, None], axis=1)           # [Nq, D]
    protos = _l2norm(protos)
    qv = _l2norm(qv)[:, None, :]
    dist = jnp.einsum('bqd,bwd->bqw', qv, protos)
    logits = (dist / temperature).reshape(-1, 5)
    logp = jax.nn.log_softmax(logits, axis=-1)
    loss = -jnp.mean(jnp.take_along_axis(logp, y_query[:, None], axis=-1))
    return loss, logits


# --------------------------------------- main --------------------------------------- #
if __name__ == "__main__":
    key = jax.random.PRNGKey(0)
    D = 128          # encoder_dim (lane-friendly stand-in for ViT-small's 384)
    P = 16           # num_patches = (img_size // patch_size) ** 2, e.g. 32 / 8
    S = P + 1        # tokens per image incl. CLS
    H = 4            # attention heads in the backbone attn maps
    NWAY, SHOTS = 5, 2
    Ns = NWAY * SHOTS        # support images (5-way, 2-shot)
    Nq = 4                   # query images
    TEMP = 0.1               # temperature

    k1, k2, k3, k4, k5 = jax.random.split(key, 5)
    x_support = jax.random.normal(k1, (Ns, S, D), jnp.float32)          # encoder layer tokens
    x_query = jax.random.normal(k2, (Nq, S, D), jnp.float32)
    support_attn = jax.nn.softmax(
        jax.random.normal(k3, (Ns, H, S, S), jnp.float32), axis=-1)
    query_attn = jax.nn.softmax(
        jax.random.normal(k4, (Nq, H, S, S), jnp.float32), axis=-1)
    y_query = jax.random.randint(k5, (Nq,), 0, NWAY)

    # parameters (deterministic, per module __init__):
    #   nn.LayerNorm(encoder_dim): gamma = 1, beta = 0
    #   object_queries embedding exists but is unused on this forward path
    #   CrossAttention q/k/v/o replaced by nn.Identity (train_w_qkv=False, train_w_o=False)
    gamma = jnp.ones((1, D), jnp.float32)
    beta = jnp.zeros((1, D), jnp.float32)

    loss, logits = setfsl_forward(x_support, x_query, support_attn, query_attn,
                                  y_query, gamma, beta, TEMP, P)
    jax.block_until_ready((loss, logits))

    ref_loss, ref_logits = setfsl_reference(x_support, x_query, support_attn, query_attn,
                                            y_query, gamma, beta, TEMP, P)
    np.testing.assert_allclose(np.asarray(logits), np.asarray(ref_logits),
                               rtol=1e-3, atol=1e-3)
    np.testing.assert_allclose(float(loss), float(ref_loss), rtol=1e-3, atol=1e-3)
    print("KERNEL_OK")
</pallas_src>

<mosaic_0001>
module attributes {stable_mosaic.version = 11 : i64} {
  func.func @setfsl_kernel(%arg0: i32, %arg1: memref<160x128xf32, #tpu.memory_space<vmem>>, %arg2: memref<2x17x128xf32, #tpu.memory_space<vmem>>, %arg3: memref<5x160xf32, #tpu.memory_space<vmem>>, %arg4: memref<2x1x17xf32, #tpu.memory_space<vmem>>, %arg5: memref<1x128xf32, #tpu.memory_space<vmem>>, %arg6: memref<1x128xf32, #tpu.memory_space<vmem>>, %arg7: memref<2x1x128xf32, #tpu.memory_space<vmem>>, %arg8: memref<2x5x128xf32, #tpu.memory_space<vmem>>) attributes {dimension_semantics = [#tpu.dimension_semantics<parallel>], iteration_bounds = array<i64: 2>, scalar_prefetch = 0 : i64, scratch_operands = 0 : i64, tpu.core_type = #tpu.core_type<tc>, window_params = [{pipeline_mode = #tpu.pipeline_mode<synchronous>, transform_indices = @transform_0, window_bounds = array<i64: 160, 128>}, {transform_indices = @transform_1, window_bounds = array<i64: 2, 17, 128>}, {pipeline_mode = #tpu.pipeline_mode<synchronous>, transform_indices = @transform_2, window_bounds = array<i64: 5, 160>}, {transform_indices = @transform_3, window_bounds = array<i64: 2, 1, 17>}, {pipeline_mode = #tpu.pipeline_mode<synchronous>, transform_indices = @transform_4, window_bounds = array<i64: 1, 128>}, {pipeline_mode = #tpu.pipeline_mode<synchronous>, transform_indices = @transform_5, window_bounds = array<i64: 1, 128>}, {transform_indices = @transform_6, window_bounds = array<i64: 2, 1, 128>}, {transform_indices = @transform_7, window_bounds = array<i64: 2, 5, 128>}]} {
    %c0 = arith.constant 0 : index
    %c0_0 = arith.constant 0 : index
    %0 = vector.load %arg1[%c0, %c0_0] : memref<160x128xf32, #tpu.memory_space<vmem>>, vector<160x128xf32>
    %c0_1 = arith.constant 0 : index
    %c0_2 = arith.constant 0 : index
    %c0_3 = arith.constant 0 : index
    %1 = vector.load %arg2[%c0_1, %c0_2, %c0_3] : memref<2x17x128xf32, #tpu.memory_space<vmem>>, vector<2x17x128xf32>
    %c0_4 = arith.constant 0 : index
    %c0_5 = arith.constant 0 : index
    %2 = vector.load %arg3[%c0_4, %c0_5] : memref<5x160xf32, #tpu.memory_space<vmem>>, vector<5x160xf32>
    %c0_6 = arith.constant 0 : index
    %c0_7 = arith.constant 0 : index
    %c0_8 = arith.constant 0 : index
    %3 = vector.load %arg4[%c0_6, %c0_7, %c0_8] : memref<2x1x17xf32, #tpu.memory_space<vmem>>, vector<2x1x17xf32>
    %c0_9 = arith.constant 0 : index
    %c0_10 = arith.constant 0 : index
    %4 = vector.load %arg5[%c0_9, %c0_10] : memref<1x128xf32, #tpu.memory_space<vmem>>, vector<1x128xf32>
    %c0_11 = arith.constant 0 : index
    %c0_12 = arith.constant 0 : index
    %5 = vector.load %arg6[%c0_11, %c0_12] : memref<1x128xf32, #tpu.memory_space<vmem>>, vector<1x128xf32>
    %6 = vector.shape_cast %0 : vector<160x128xf32> to vector<1x160x128xf32>
    %7 = vector.shape_cast %6 : vector<1x160x128xf32> to vector<1x160x128xf32>
    %8 = vector.broadcast %7 : vector<1x160x128xf32> to vector<2x160x128xf32>
    "tpu.trace_start"() <{level = 10 : i32, message = "qpd,qsd->qps"}> : () -> ()
    %cst = arith.constant dense<0.000000e+00> : vector<2x160x17xf32>
    %9 = tpu.matmul %8, %1, %cst {dimension_numbers = #tpu.dot_dimension_numbers<[2], [2], [1], [1], [0, 0, 0, 1, 1, 1], [0], [0]>} : vector<2x160x128xf32>, vector<2x17x128xf32>, vector<2x160x17xf32> -> vector<2x160x17xf32>
    "tpu.trace_stop"() : () -> ()
    %cst_13 = arith.constant 0.0883883461 : f32
    %10 = vector.broadcast %cst_13 : f32 to vector<2x160x17xf32>
    %11 = arith.mulf %9, %10 : vector<2x160x17xf32>
    %cst_14 = arith.constant dense<0xFF800000> : vector<2x160xf32>
    %12 = vector.multi_reduction <maximumf>, %11, %cst_14 [2] : vector<2x160x17xf32> to vector<2x160xf32>
    %13 = vector.shape_cast %12 : vector<2x160xf32> to vector<2x160x1xf32>
    %14 = vector.broadcast %13 : vector<2x160x1xf32> to vector<2x160x17xf32>
    %15 = arith.subf %11, %14 : vector<2x160x17xf32>
    %16 = math.exp %15 : vector<2x160x17xf32>
    %cst_15 = arith.constant dense<0.000000e+00> : vector<2x160xf32>
    %17 = vector.multi_reduction <add>, %16, %cst_15 [2] : vector<2x160x17xf32> to vector<2x160xf32>
    %18 = vector.shape_cast %17 : vector<2x160xf32> to vector<2x160x1xf32>
    %19 = tpu.reciprocal %18 {approx = true} : vector<2x160x1xf32> -> vector<2x160x1xf32>
    %20 = vector.broadcast %19 : vector<2x160x1xf32> to vector<2x160x17xf32>
    %21 = arith.mulf %16, %20 : vector<2x160x17xf32>
    "tpu.trace_start"() <{level = 10 : i32, message = "qps,qsd->qpd"}> : () -> ()
    %cst_16 = arith.constant dense<0.000000e+00> : vector<2x160x128xf32>
    %22 = tpu.matmul %21, %1, %cst_16 {dimension_numbers = #tpu.dot_dimension_numbers<[2], [1], [1], [2], [0, 0, 0, 1, 1, 2], [0], [0]>} : vector<2x160x17xf32>, vector<2x17x128xf32>, vector<2x160x128xf32> -> vector<2x160x128xf32>
    "tpu.trace_stop"() : () -> ()
    %23 = arith.addf %8, %22 : vector<2x160x128xf32>
    %cst_17 = arith.constant dense<0.000000e+00> : vector<2x160xf32>
    %24 = vector.multi_reduction <add>, %23, %cst_17 [2] : vector<2x160x128xf32> to vector<2x160xf32>
    %25 = vector.shape_cast %24 : vector<2x160xf32> to vector<2x160x1xf32>
    %cst_18 = arith.constant 1.280000e+02 : f32
    %26 = vector.broadcast %cst_18 : f32 to vector<2x160x1xf32>
    %27 = arith.divf %25, %26 : vector<2x160x1xf32>
    %28 = vector.broadcast %27 : vector<2x160x1xf32> to vector<2x160x128xf32>
    %29 = arith.subf %23, %28 : vector<2x160x128xf32>
    %30 = arith.mulf %29, %29 : vector<2x160x128xf32>
    %cst_19 = arith.constant dense<0.000000e+00> : vector<2x160xf32>
    %31 = vector.multi_reduction <add>, %30, %cst_19 [2] : vector<2x160x128xf32> to vector<2x160xf32>
    %32 = vector.shape_cast %31 : vector<2x160xf32> to vector<2x160x1xf32>
    %cst_20 = arith.constant 1.280000e+02 : f32
    %33 = vector.broadcast %cst_20 : f32 to vector<2x160x1xf32>
    %34 = arith.divf %32, %33 : vector<2x160x1xf32>
    %35 = vector.broadcast %27 : vector<2x160x1xf32> to vector<2x160x128xf32>
    %36 = arith.subf %23, %35 : vector<2x160x128xf32>
    %cst_21 = arith.constant 9.99999974E-6 : f32
    %37 = vector.broadcast %cst_21 : f32 to vector<2x160x1xf32>
    %38 = arith.addf %34, %37 : vector<2x160x1xf32>
    %39 = math.rsqrt %38 : vector<2x160x1xf32>
    %40 = vector.broadcast %39 : vector<2x160x1xf32> to vector<2x160x128xf32>
    %41 = arith.mulf %36, %40 : vector<2x160x128xf32>
    %42 = vector.shape_cast %4 : vector<1x128xf32> to vector<1x1x128xf32>
    %43 = vector.broadcast %42 : vector<1x1x128xf32> to vector<2x160x128xf32>
    %44 = arith.mulf %41, %43 : vector<2x160x128xf32>
    %45 = vector.shape_cast %5 : vector<1x128xf32> to vector<1x1x128xf32>
    %46 = vector.broadcast %45 : vector<1x1x128xf32> to vector<2x160x128xf32>
    %47 = arith.addf %44, %46 : vector<2x160x128xf32>
    %48 = vector.shape_cast %2 : vector<5x160xf32> to vector<1x5x160xf32>
    %49 = vector.shape_cast %48 : vector<1x5x160xf32> to vector<1x5x160xf32>
    %50 = vector.broadcast %49 : vector<1x5x160xf32> to vector<2x5x160xf32>
    "tpu.trace_start"() <{level = 10 : i32, message = "qwp,qpd->qwd"}> : () -> ()
    %cst_22 = arith.constant dense<0.000000e+00> : vector<2x5x128xf32>
    %51 = tpu.matmul %50, %47, %cst_22 {dimension_numbers = #tpu.dot_dimension_numbers<[2], [1], [1], [2], [0, 0, 0, 1, 1, 2], [0], [0]>} : vector<2x5x160xf32>, vector<2x160x128xf32>, vector<2x5x128xf32> -> vector<2x5x128xf32>
    "tpu.trace_stop"() : () -> ()
    %cst_23 = arith.constant dense<0.000000e+00> : vector<2x17xf32>
    %52 = vector.multi_reduction <add>, %1, %cst_23 [2] : vector<2x17x128xf32> to vector<2x17xf32>
    %53 = vector.shape_cast %52 : vector<2x17xf32> to vector<2x17x1xf32>
    %cst_24 = arith.constant 1.280000e+02 : f32
    %54 = vector.broadcast %cst_24 : f32 to vector<2x17x1xf32>
    %55 = arith.divf %53, %54 : vector<2x17x1xf32>
    %56 = vector.broadcast %55 : vector<2x17x1xf32> to vector<2x17x128xf32>
    %57 = arith.subf %1, %56 : vector<2x17x128xf32>
    %58 = arith.mulf %57, %57 : vector<2x17x128xf32>
    %cst_25 = arith.constant dense<0.000000e+00> : vector<2x17xf32>
    %59 = vector.multi_reduction <add>, %58, %cst_25 [2] : vector<2x17x128xf32> to vector<2x17xf32>
    %60 = vector.shape_cast %59 : vector<2x17xf32> to vector<2x17x1xf32>
    %cst_26 = arith.constant 1.280000e+02 : f32
    %61 = vector.broadcast %cst_26 : f32 to vector<2x17x1xf32>
    %62 = arith.divf %60, %61 : vector<2x17x1xf32>
    %63 = vector.broadcast %55 : vector<2x17x1xf32> to vector<2x17x128xf32>
    %64 = arith.subf %1, %63 : vector<2x17x128xf32>
    %cst_27 = arith.constant 9.99999974E-6 : f32
    %65 = vector.broadcast %cst_27 : f32 to vector<2x17x1xf32>
    %66 = arith.addf %62, %65 : vector<2x17x1xf32>
    %67 = math.rsqrt %66 : vector<2x17x1xf32>
    %68 = vector.broadcast %67 : vector<2x17x1xf32> to vector<2x17x128xf32>
    %69 = arith.mulf %64, %68 : vector<2x17x128xf32>
    %70 = vector.shape_cast %4 : vector<1x128xf32> to vector<1x1x128xf32>
    %71 = vector.broadcast %70 : vector<1x1x128xf32> to vector<2x17x128xf32>
    %72 = arith.mulf %69, %71 : vector<2x17x128xf32>
    %73 = vector.shape_cast %5 : vector<1x128xf32> to vector<1x1x128xf32>
    %74 = vector.broadcast %73 : vector<1x1x128xf32> to vector<2x17x128xf32>
    %75 = arith.addf %72, %74 : vector<2x17x128xf32>
    "tpu.trace_start"() <{level = 10 : i32, message = "qos,qsd->qod"}> : () -> ()
    %cst_28 = arith.constant dense<0.000000e+00> : vector<2x1x128xf32>
    %76 = tpu.matmul %3, %75, %cst_28 {dimension_numbers = #tpu.dot_dimension_numbers<[2], [1], [1], [2], [0, 0, 0, 1, 1, 2], [0], [0]>} : vector<2x1x17xf32>, vector<2x17x128xf32>, vector<2x1x128xf32> -> vector<2x1x128xf32>
    "tpu.trace_stop"() : () -> ()
    %77 = arith.mulf %51, %51 : vector<2x5x128xf32>
    %cst_29 = arith.constant dense<0.000000e+00> : vector<2x5xf32>
    %78 = vector.multi_reduction <add>, %77, %cst_29 [2] : vector<2x5x128xf32> to vector<2x5xf32>
    %79 = vector.shape_cast %78 : vector<2x5xf32> to vector<2x5x1xf32>
    %cst_30 = arith.constant 1.000000e-24 : f32
    %80 = vector.broadcast %cst_30 : f32 to vector<2x5x1xf32>
    %81 = arith.maximumf %79, %80 : vector<2x5x1xf32>
    %82 = math.rsqrt %81 : vector<2x5x1xf32>
    %83 = vector.broadcast %82 : vector<2x5x1xf32> to vector<2x5x128xf32>
    %84 = arith.mulf %51, %83 : vector<2x5x128xf32>
    %c0_31 = arith.constant 0 : index
    %c0_32 = arith.constant 0 : index
    %c0_33 = arith.constant 0 : index
    %85 = vector.load %arg8[%c0_31, %c0_32, %c0_33] : memref<2x5x128xf32, #tpu.memory_space<vmem>>, vector<2x5x128xf32>
    tpu.vector_store %arg8[%c0_31, %c0_32, %c0_33], %84 {strides = array<i32>} : memref<2x5x128xf32, #tpu.memory_space<vmem>>, vector<2x5x128xf32>,
    %86 = arith.mulf %76, %76 : vector<2x1x128xf32>
    %cst_34 = arith.constant dense<0.000000e+00> : vector<2x1xf32>
    %87 = vector.multi_reduction <add>, %86, %cst_34 [2] : vector<2x1x128xf32> to vector<2x1xf32>
    %88 = vector.shape_cast %87 : vector<2x1xf32> to vector<2x1x1xf32>
    %cst_35 = arith.constant 1.000000e-24 : f32
    %89 = vector.broadcast %cst_35 : f32 to vector<2x1x1xf32>
    %90 = arith.maximumf %88, %89 : vector<2x1x1xf32>
    %91 = math.rsqrt %90 : vector<2x1x1xf32>
    %92 = vector.broadcast %91 : vector<2x1x1xf32> to vector<2x1x128xf32>
    %93 = arith.mulf %76, %92 : vector<2x1x128xf32>
    %c0_36 = arith.constant 0 : index
    %c0_37 = arith.constant 0 : index
    %c0_38 = arith.constant 0 : index
    %94 = vector.load %arg7[%c0_36, %c0_37, %c0_38] : memref<2x1x128xf32, #tpu.memory_space<vmem>>, vector<2x1x128xf32>
    tpu.vector_store %arg7[%c0_36, %c0_37, %c0_38], %93 {strides = array<i32>} : memref<2x1x128xf32, #tpu.memory_space<vmem>>, vector<2x1x128xf32>,
    return
  }
  func.func @transform_0(%arg0: i32) -> (i32, i32) {
    %c0_i32 = arith.constant 0 : i32
    %c0_i32_0 = arith.constant 0 : i32
    %c0_i32_1 = arith.constant 0 : i32
    return %c0_i32, %c0_i32_0 : i32, i32
  }
  func.func @transform_1(%arg0: i32) -> (i32, i32, i32) {
    %c0_i32 = arith.constant 0 : i32
    %c0_i32_0 = arith.constant 0 : i32
    %c0_i32_1 = arith.constant 0 : i32
    return %arg0, %c0_i32, %c0_i32_0 : i32, i32, i32
  }
  func.func @transform_2(%arg0: i32) -> (i32, i32) {
    %c0_i32 = arith.constant 0 : i32
    %c0_i32_0 = arith.constant 0 : i32
    %c0_i32_1 = arith.constant 0 : i32
    return %c0_i32, %c0_i32_0 : i32, i32
  }
  func.func @transform_3(%arg0: i32) -> (i32, i32, i32) {
    %c0_i32 = arith.constant 0 : i32
    %c0_i32_0 = arith.constant 0 : i32
    %c0_i32_1 = arith.constant 0 : i32
    return %arg0, %c0_i32, %c0_i32_0 : i32, i32, i32
  }
  func.func @transform_4(%arg0: i32) -> (i32, i32) {
    %c0_i32 = arith.constant 0 : i32
    %c0_i32_0 = arith.constant 0 : i32
    %c0_i32_1 = arith.constant 0 : i32
    return %c0_i32, %c0_i32_0 : i32, i32
  }
  func.func @transform_5(%arg0: i32) -> (i32, i32) {
    %c0_i32 = arith.constant 0 : i32
    %c0_i32_0 = arith.constant 0 : i32
    %c0_i32_1 = arith.constant 0 : i32
    return %c0_i32, %c0_i32_0 : i32, i32
  }
  func.func @transform_6(%arg0: i32) -> (i32, i32, i32) {
    %c0_i32 = arith.constant 0 : i32
    %c0_i32_0 = arith.constant 0 : i32
    %c0_i32_1 = arith.constant 0 : i32
    return %arg0, %c0_i32, %c0_i32_0 : i32, i32, i32
  }
  func.func @transform_7(%arg0: i32) -> (i32, i32, i32) {
    %c0_i32 = arith.constant 0 : i32
    %c0_i32_0 = arith.constant 0 : i32
    %c0_i32_1 = arith.constant 0 : i32
    return %arg0, %c0_i32, %c0_i32_0 : i32, i32, i32
  }
}

</mosaic_0001>

<bundles_post_ra>
// kernel: tpu_custom_call.1
= control target key start
LH: loop header
LB: loop body
LE: loop exit
PB: predicated region body
PF: predicated region fallthrough
CT: control target
= control target key end

     0   :  { %13 = vsyncpa [#allocation3], 0  ;;  %s4943_s0 = inlined_call_operand.vmem [shape: f32[160,128], index: 0, kind: input, shape index: {}]   ;;  %s4944_s1 = inlined_call_operand.vmem [shape: f32[4,17,128], index: 1, kind: input, shape index: {}]   ;;  %s4945_s2 = inlined_call_operand.hbm [shape: f32[5,160], index: 2, kind: input, shape index: {}]   ;;  %s4946_s3 = inlined_call_operand.vmem [shape: f32[4,1,17], index: 3, kind: input, shape index: {}]   ;;  %s4947_s4 = inlined_call_operand.vmem [shape: f32[1,128], index: 4, kind: input, shape index: {}]   ;;  %s4948_s5 = inlined_call_operand.vmem [shape: f32[1,128], index: 5, kind: input, shape index: {}]   ;;  %s4949_s6 = inlined_call_operand.hbm [shape: f32[4,1,128], index: 6, kind: output, shape index: {0}]   ;;  %s4950_s7 = inlined_call_operand.vmem [shape: f32[4,5,128], index: 7, kind: output, shape index: {1}]  }
   0x1   :  { %14 = vsyncpa [#allocation4], 0 }
   0x2   :  { %16 = vsyncpa [#allocation4 + $0x1], 0  ;;  %s3645_s24 = smov 0   ;;  %s3647_s25 = smov 0  }
   0x3   :  { %s3649_s26 = smov 0   ;;  %s3651_s27 = smov 0  }
   0x4 LB: > { %s3666_s28 = sadd.s32 4294967295, %s3596_s27   ;;  %s2744_s29 = sadd.s32 4294967294, %s3596_s27   ;;  %s3596_s27 = sphi %s3651_s27, %s4981_s27   ;;  %s3592_s26 = sphi %s3649_s26, %s4980_s26   ;;  %s3588_s25 = sphi %s3647_s25, %s4979_s25   ;;  %s3584_s24 = sphi %s3645_s24, %s4978_s24  }
   0x5   : > { %s3670_s30 = sadd.s32 1, %s3596_s27   ;;  %s165_s8 = sadd.s32 1, %s3592_s26 }
   0x6   : > { %s162_s9 = ssub.s32 %s3596_s27, %s3670_s30  ;;  %p175_p0 = scmp.ne.s32.totalorder %s3592_s26, %s3588_s25 }
   0x7   : > { %p163_p1 = scmp.eq.s32.totalorder %s162_s9, 0  ;;  %p176_p2 = scmp.eq.s32.totalorder %s3666_s28, 1 }
   0x8   : > { %p181_p3 = scmp.ne.s32.totalorder %s3588_s25, %s3584_s24  ;;  %p182_p4 = scmp.eq.s32.totalorder %s2744_s29, 1 }
   0x9   : > { %s3681_s10 = scalar_select %p163_p1, %s3592_s26, %s165_s8  }
   0xa   : > { %p3683_p5 = por %p176_p2, %p175_p0  ;;  %p3687_p6 = por %p182_p4, %p181_p3 }
   0xb   : > { %p2745_p7 = scmp.ge.s32.totalorder %s3596_s27, 1  ;;  %p215_p8 = scmp.lt.s32.totalorder %s3596_s27, 3 }
   0xc   : > { %s4960_s11 = scalar_select %p3683_p5, 1, 0 }
   0xd   : > { %s4961_s12 = scalar_select %p3687_p6, 1, 0 }
   0xe   : > { %p4951_p9 = scmp.eq.s32.totalorder %s3666_s28, 0  ;;  %p3694_p10 = pnand %p2745_p7, %p215_p8 }
   0xf   : > { %s3598_s14 = smov [#allocation2]   ;;  %s3502_s19 = scalar_lea.hbm %s4945_s2, 256 }
  0x10   : > { %s4962_s13 = scalar_select %p3694_p10, 1, 0 }
  0x11   : > { %s231_s15 = sshll.u32 %s3598_s14, 4  ;;  %p3163_p11 = pneg %p3694_p10  ;;  %s232_s15 = int_to_ptr.vmem [resolvable:$true] %s231_s15 }
  0x12   : > { %p3503_p13 = scmp.ne.s32.totalorder %s4945_s2, %s3502_s19  ;;  %p3509_p3 = scmp.lt.u32.totalorder %s3502_s19, %s4945_s2 }
  0x13   : > { %p3702_p12 = pnand %p4951_p9, %p3163_p11 }
  0x15   : > { %p3504_p0 = pneg %p3702_p12 }
  0x17   : > { %p3505_p1 = pnand %p3504_p0, %p3503_p13 }
  0x19   : > { %p3506_p2 = pneg %p3505_p1 }
  0x1b   : > { %p3511_p4 = pnand %p3509_p3, %p3506_p2 }
  0x1d   : > { %3514 = shalt.err (!%p3511_p4)
}
  0x1e   : > { %s3515_s29 = scalar_lea.vmem %s232_s15, 256  ;;  %p3523_p9 = scmp.lt.s32.totalorder %s232_s15, %s232_s15 }
  0x1f   : > { %p3516_p7 = scmp.ne.s32.totalorder %s232_s15, %s3515_s29  ;;  %p3524_p6 = scmp.lt.s32.totalorder %s3515_s29, %s3515_s29 }
  0x21   : > { %p3518_p8 = pnand %p3516_p7, %p3504_p0  ;;  %p3525_p5 = por %p3524_p6, %p3523_p9 }
  0x23   : > { %p3519_p11 = pneg %p3518_p8 }
  0x25   : > { %p3526_p10 = pnand %p3525_p5, %p3519_p11 }
  0x27   : > { %3529 = shalt.err (!%p3526_p10)
}
  0x28   : > { %3166 = dma.hbm_to_vmem [thread:$0]  (!%p3702_p12), %s4945_s2, 256, %s232_s15, [#allocation3]  }
  0x29   : > { %p4964_p13 = scmp.ne.s32.totalorder %s4962_s13, 0 }
  0x2b   : > { %268 = sbr.rel (%p4964_p13) target bundleno = 1609 (0x649), region = 44 }
  0x32   : > { %p4965_p1 = scmp.eq.s32.totalorder %s3666_s28, 0 }
  0x34   : > { %3575 = dma.done.wait (%p4965_p1), [#allocation3], 256   ;;  %p4966_p0 = pmov %p4965_p1 }
  0x35   : > { %s2751_s14 = sshll.u32 %s3666_s28, 1  ;;  %v329_v0 = vld [vmem:[%s4943_s0] sm:$0xff]  ;;  %v330_v9 = vld [vmem:[%s4943_s0 + $0x8] sm:$0xff]  ;;  %v331_v10 = vld [vmem:[%s4943_s0 + $0x10] sm:$0xff]  ;;  %vm731_vm0 = vcmask 138240   ;;  %vm1232_vm1 = vcmask 1040384  }
  0x36   : > { %3577 = vsyncadd (%p4966_p0), [#allocation3], 4294967040  ;;  %p311_p6 = scmp.lt.s32.totalorder %s2751_s14, 3  ;;  %2918 = vmatprep.mubr.f32.mxu0 %v329_v0  ;;  %2954 = vmatprep.mubr.f32.mxu1 %v329_v0  ;;  %v332_v11 = vld [vmem:[%s4943_s0 + $0x18] sm:$0xff]  ;;  %v333_v12 = vld [vmem:[%s4943_s0 + $0x20] sm:$0xff]  ;;  %vm2202_vm2 = vcmask 261120  }
  0x37   : > { %v334_v13 = vld [vmem:[%s4943_s0 + $0x28] sm:$0xff]  ;;  %v335_v14 = vld [vmem:[%s4943_s0 + $0x30] sm:$0xff]  ;;  %v336_v15 = vld [vmem:[%s4943_s0 + $0x38] sm:$0xff]  ;;  %vm3601_vm3 = vmmov 0   ;;  %vm2582_vm4 = vcmask 1044480   ;;  %s300_s29 = sand.u32 1, %s3588_s25  }
  0x38   : > { %s4983_s14 = smov (!%p311_p6, %s2751_s14), 3  ;;  %v337_v16 = vld [vmem:[%s4943_s0 + $0x40] sm:$0xff]  ;;  %v338_v17 = vld [vmem:[%s4943_s0 + $0x48] sm:$0xff]  ;;  %v339_v18 = vld [vmem:[%s4943_s0 + $0x50] sm:$0xff]  ;;  %s2750_s8 = sshll.u32 %s300_s29, 1 }
  0x39   : > { %s3156_s16 = smul.u32 24, %s4983_s14  ;;  %v340_v19 = vld [vmem:[%s4943_s0 + $0x58] sm:$0xff]  ;;  %v341_v20 = vld [vmem:[%s4943_s0 + $0x60] sm:$0xff]  ;;  %v342_v21 = vld [vmem:[%s4943_s0 + $0x68] sm:$0xff]  ;;  %s320_s19 = scalar_lea.vmem %s4946_s3, %s4983_s14 }
  0x3a   : > { %v343_v22 = vld [vmem:[%s4943_s0 + $0x70] sm:$0xff]  ;;  %v344_v23 = vld [vmem:[%s4943_s0 + $0x78] sm:$0xff]  ;;  %v345_v24 = vld [vmem:[%s4943_s0 + $0x80] sm:$0xff]  ;;  %s2755_s20 = sshll.u32 %s4983_s14, 3  ;;  %s302_s14 = scalar_lea.vmem [#allocation5], %s2750_s8 }
  0x3b   : > { %s3735_s15 = scalar_lea.vmem %s4944_s1, %s3156_s16  ;;  %v346_v25 = vld [vmem:[%s4943_s0 + $0x88] sm:$0xff]  ;;  %v347_v26 = vld [vmem:[%s4943_s0 + $0x90] sm:$0xff]  ;;  %v348_v27 = vld [vmem:[%s4943_s0 + $0x98] sm:$0xff]  ;;  %s4889_s23 = scalar_lea.vmem %s4950_s7, %s2755_s20 }
  0x3c   : > { %v349_v1 = vld [vmem:[%s3735_s15] sm:$0xff]  ;;  %v350_v2 = vld [vmem:[%s3735_s15 + $0x8] sm:$0xff]  ;;  %v352_v3 = vld [vmem:[%s3735_s15 + $0x18] sm:$0xff]  ;;  %s2632_s9 = sshll.u32 %s302_s14, 4  ;;  %p4976_p9 = scmp.ne.s32.totalorder %s4960_s11, 0  ;;  %s4899_s9 = int_to_ptr.vmem [resolvable:$true] %s2632_s9 }
  0x3d   : > { %v3074_v4 = vpack.c.bf16 %v350_v2, %v349_v1  ;;  %v353_v5 = vld [vmem:[%s3735_s15 + $0x20] sm:$0xff]  ;;  %v3745_v7 = vld [vmem:[%s3735_s15 + $0x10] sm:$0x1]  ;;  %v3748_v8 = vld [vmem:[%s3735_s15 + $0x28] sm:$0x1]  ;;  %s3530_s13 = scalar_lea.vmem %s4899_s9, 32 }
  0x3e   : > { %v3078_v6 = vpack.c.bf16 %v353_v5, %v352_v3  ;;  %p3531_p5 = scmp.ne.s32.totalorder %s4899_s9, %s3530_s13 }
  0x3f   : > { %3075 = vmatprep.subr.bf16.mxu0 %v3074_v4 }
  0x40   : > { %3077 = vmatpush3.bf16.xpose.msra.mxu0 %v3074_v4  ;;  %3079 = vmatprep.subr.bf16.mxu1 %v3078_v6  ;;  %p3532_p10 = pnand %p3531_p5, %p4976_p9 }
  0x41   : > { %3081 = vmatpush3.bf16.xpose.msra.mxu1 %v3078_v6  ;;  %2916 = vmatprep.subr.mxu0 %v3745_v7 }
  0x42   : > { %2952 = vmatprep.subr.mxu1 %v3748_v8  ;;  %p3533_p12 = pneg %p3532_p10 }
  0x48   : > { %2917 = vmatpush3.xpose.msra.mxu0 %v3745_v7 }
  0x49   : > { %2953 = vmatpush3.xpose.msra.mxu1 %v3748_v8  ;;  %3083 = vmatprep.subr.bf16.mxu0 %v3074_v4 }
  0x4a   : > { %3087 = vmatprep.subr.bf16.mxu1 %v3078_v6 }
  0x4b   : > { %2919 = vmatmul.mubr.f32.vlgmr.msra.gmra.mrb[0].mxu0 %v330_v9 }
  0x4c   : > { %2955 = vmatmul.mubr.f32.vlgmr.msra.gmra.mrb[0].mxu1 %v330_v9  ;;  %2921 = vmatprep.mubr.f32.mxu0 %v331_v10 }
  0x4d   : > { %2957 = vmatprep.mubr.f32.mxu1 %v331_v10  ;;  %3085 = vmatpush3.bf16.msra.mxu0 %v3074_v4 }
  0x4e   : > { %3089 = vmatpush3.bf16.msra.mxu1 %v3078_v6  ;;  %2988 = vmatprep.subr.msk.mxu0 %vm1232_vm1, %v3745_v7 }
  0x4f   : > { %2922 = vmatmul.mubr.f32.gmra.mrb[2].mxu0 %v332_v11  ;;  %3024 = vmatprep.subr.msk.mxu1 %vm1232_vm1, %v3748_v8 }
  0x50   : > { %2958 = vmatmul.mubr.f32.gmra.mrb[2].mxu1 %v332_v11  ;;  %2924 = vmatprep.mubr.f32.mxu0 %v333_v12 }
  0x51   : > { %2960 = vmatprep.mubr.f32.mxu1 %v333_v12  ;;  %2989 = vmatpush3.msk.msra.mxu0 %vm1232_vm1, %v3745_v7 }
  0x52   : > { %3025 = vmatpush3.msk.msra.mxu1 %vm1232_vm1, %v3748_v8 }
  0x53   : > { %2925 = vmatmul.mubr.f32.gmra.mrb[4].mxu0 %v334_v13 }
  0x54   : > { %2961 = vmatmul.mubr.f32.gmra.mrb[4].mxu1 %v334_v13  ;;  %2927 = vmatprep.mubr.f32.mxu0 %v335_v14 }
  0x55   : > { %2963 = vmatprep.mubr.f32.mxu1 %v335_v14 }
  0x57   : > { %2928 = vmatmul.mubr.f32.gmra.mrb[6].mxu0 %v336_v15 }
  0x58   : > { %2964 = vmatmul.mubr.f32.gmra.mrb[6].mxu1 %v336_v15  ;;  %2930 = vmatprep.mubr.f32.mxu0 %v337_v16 }
  0x59   : > { %2966 = vmatprep.mubr.f32.mxu1 %v337_v16 }
  0x5b   : > { %2931 = vmatmul.mubr.f32.gmra.mrb[8].mxu0 %v338_v17 }
  0x5c   : > { %2967 = vmatmul.mubr.f32.gmra.mrb[8].mxu1 %v338_v17  ;;  %2933 = vmatprep.mubr.f32.mxu0 %v339_v18 }
  0x5d   : > { %2969 = vmatprep.mubr.f32.mxu1 %v339_v18 }
  0x5f   : > { %2934 = vmatmul.mubr.f32.gmra.mrb[10].mxu0 %v340_v19 }
  0x60   : > { %2970 = vmatmul.mubr.f32.gmra.mrb[10].mxu1 %v340_v19  ;;  %2936 = vmatprep.mubr.f32.mxu0 %v341_v20 }
  0x61   : > { %2972 = vmatprep.mubr.f32.mxu1 %v341_v20 }
  0x63   : > { %2937 = vmatmul.mubr.f32.gmra.mrb[12].mxu0 %v342_v21 }
  0x64   : > { %2973 = vmatmul.mubr.f32.gmra.mrb[12].mxu1 %v342_v21  ;;  %2939 = vmatprep.mubr.f32.mxu0 %v343_v22 }
  0x65   : > { %2975 = vmatprep.mubr.f32.mxu1 %v343_v22 }
  0x67   : > { %2940 = vmatmul.mubr.f32.gmra.mrb[14].mxu0 %v344_v23 }
  0x68   : > { %2976 = vmatmul.mubr.f32.gmra.mrb[14].mxu1 %v344_v23  ;;  %2942 = vmatprep.mubr.f32.mxu0 %v345_v24 }
  0x69   : > { %2978 = vmatprep.mubr.f32.mxu1 %v345_v24 }
  0x6b   : > { %2943 = vmatmul.mubr.f32.gmra.mrb[16].mxu0 %v346_v25 }
  0x6c   : > { %2979 = vmatmul.mubr.f32.gmra.mrb[16].mxu1 %v346_v25  ;;  %2945 = vmatprep.mubr.f32.mxu0 %v347_v26 }
  0x6d   : > { %2981 = vmatprep.mubr.f32.mxu1 %v347_v26 }
  0x6f   : > { %2946 = vmatmul.mubr.f32.gmra.mrb[18].mxu0 %v348_v27 }
  0x70   : > { %2982 = vmatmul.mubr.f32.gmra.mrb[18].mxu1 %v348_v27 }
 0x11e   : > { %v2920_v28 = vpop.f32.mrb[0].mxu0 }
 0x11f   : > { %v3811_v29 = vmul.f32 0.088388346, %v2920_v28  ;;  %v427_v30 = vpop.f32.mrb[1].mxu0  ;;  %v2956_v31 = vpop.f32.mrb[0].mxu1 }
 0x120   : > { %v3813_v32 = vmul.f32 0.088388346, %v427_v30  ;;  %v3815_v33 = vmul.f32 0.088388346, %v2956_v31  ;;  %v592_v34 = vpop.f32.mrb[1].mxu1 }
 0x121   : > { %v3817_v35 = vmul.f32 0.088388346, %v592_v34  ;;  %v735_v36 = vsel %vm731_vm0, %v3811_v29, -inf }
 0x122   : > { %736 = vmax.xlane.f32.xlu1 %v735_v36  ;;  %v732_v37 = vsel %vm731_vm0, %v3813_v32, -inf  ;;  %v2923_v38 = vpop.f32.mrb[2].mxu0  ;;  %v795_v40 = vsel %vm731_vm0, %v3815_v33, -inf }
 0x123   : > { %733 = vmax.xlane.f32.xlu0 %v732_v37  ;;  %v2959_v39 = vpop.f32.mrb[2].mxu1  ;;  %v437_v41 = vpop.f32.mrb[3].mxu0  ;;  %v3827_v43 = vmul.f32 0.088388346, %v2923_v38  ;;  %v792_v44 = vsel %vm731_vm0, %v3817_v35, -inf }
 0x124   : > { %v3825_v42 = vmul.f32 0.088388346, %v2959_v39  ;;  %v602_v45 = vpop.f32.mrb[3].mxu1  ;;  %v3837_v53 = vmul.f32 0.088388346, %v437_v41 }
 0x125   : > { %v3831_v47 = vmul.f32 0.088388346, %v602_v45  ;;  %v741_v51 = vsel %vm731_vm0, %v3827_v43, -inf }
 0x126   : > { %796 = vmax.xlane.f32.xlu1 %v795_v40  ;;  %v2926_v46 = vpop.f32.mrb[4].mxu0  ;;  %v801_v48 = vsel %vm731_vm0, %v3825_v42, -inf  ;;  %v738_v61 = vsel %vm731_vm0, %v3837_v53, -inf }
 0x127   : > { %793 = vmax.xlane.f32.xlu0 %v792_v44  ;;  %v2962_v49 = vpop.f32.mrb[4].mxu1  ;;  %v447_v50 = vpop.f32.mrb[5].mxu0  ;;  %v798_v56 = vsel %vm731_vm0, %v3831_v47, -inf  ;;  %v3843_v59 = vmul.f32 0.088388346, %v2926_v46 }
 0x128   : > { %v612_v52 = vpop.f32.mrb[5].mxu1  ;;  %v3839_v55 = vmul.f32 0.088388346, %v2962_v49  ;;  %v3853_v5 = vmul.f32 0.088388346, %v447_v50 }
 0x129   : > { %v3847_v63 = vmul.f32 0.088388346, %v612_v52  ;;  %v747_v3 = vsel %vm731_vm0, %v3843_v59, -inf }
 0x12a   : > { %802 = vmax.xlane.f32.xlu1 %v801_v48  ;;  %v2929_v54 = vpop.f32.mrb[6].mxu0  ;;  %v807_v0 = vsel %vm731_vm0, %v3839_v55, -inf  ;;  %v744_v15 = vsel %vm731_vm0, %v3853_v5, -inf }
 0x12b   : > { %742 = vmax.xlane.f32.xlu0 %v741_v51  ;;  %v2965_v57 = vpop.f32.mrb[6].mxu1  ;;  %v457_v58 = vpop.f32.mrb[7].mxu0  ;;  %v804_v10 = vsel %vm731_vm0, %v3847_v63, -inf  ;;  %v3859_v13 = vmul.f32 0.088388346, %v2929_v54 }
 0x12c   : > { %v622_v60 = vpop.f32.mrb[7].mxu1  ;;  %v3855_v9 = vmul.f32 0.088388346, %v2965_v57  ;;  %v3869_v23 = vmul.f32 0.088388346, %v457_v58 }
 0x12d   : > { %v3863_v17 = vmul.f32 0.088388346, %v622_v60  ;;  %v753_v21 = vsel %vm731_vm0, %v3859_v13, -inf }
 0x12e   : > { %799 = vmax.xlane.f32.xlu1 %v798_v56  ;;  %v2932_v62 = vpop.f32.mrb[8].mxu0  ;;  %v813_v18 = vsel %vm731_vm0, %v3855_v9, -inf  ;;  %v750_v34 = vsel %vm731_vm0, %v3869_v23, -inf }
 0x12f   : > { %739 = vmax.xlane.f32.xlu0 %v738_v61  ;;  %v2968_v1 = vpop.f32.mrb[8].mxu1  ;;  %v467_v2 = vpop.f32.mrb[9].mxu0  ;;  %v810_v26 = vsel %vm731_vm0, %v3863_v17, -inf  ;;  %v3875_v30 = vmul.f32 0.088388346, %v2932_v62 }
 0x130   : > { %v632_v4 = vpop.f32.mrb[9].mxu1  ;;  %v3871_v25 = vmul.f32 0.088388346, %v2968_v1  ;;  %v3885_v45 = vmul.f32 0.088388346, %v467_v2 }
 0x131   : > { %v3879_v37 = vmul.f32 0.088388346, %v632_v4  ;;  %v759_v41 = vsel %vm731_vm0, %v3875_v30, -inf }
 0x132   : > { %808 = vmax.xlane.f32.xlu1 %v807_v0  ;;  %v2935_v6 = vpop.f32.mrb[10].mxu0  ;;  %v819_v38 = vsel %vm731_vm0, %v3871_v25, -inf  ;;  %v756_v56 = vsel %vm731_vm0, %v3885_v45, -inf }
 0x133   : > { %748 = vmax.xlane.f32.xlu0 %v747_v3  ;;  %v2971_v11 = vpop.f32.mrb[10].mxu1  ;;  %v477_v12 = vpop.f32.mrb[11].mxu0  ;;  %v816_v49 = vsel %vm731_vm0, %v3879_v37, -inf  ;;  %v3891_v52 = vmul.f32 0.088388346, %v2935_v6 }
 0x134   : > { %v642_v14 = vpop.f32.mrb[11].mxu1  ;;  %v3887_v48 = vmul.f32 0.088388346, %v2971_v11  ;;  %v3901_v61 = vmul.f32 0.088388346, %v477_v12 }
 0x135   : > { %v3895_v57 = vmul.f32 0.088388346, %v642_v14  ;;  %v765_v60 = vsel %vm731_vm0, %v3891_v52, -inf }
 0x136   : > { %805 = vmax.xlane.f32.xlu1 %v804_v10  ;;  %v2938_v16 = vpop.f32.mrb[12].mxu0  ;;  %v825_v58 = vsel %vm731_vm0, %v3887_v48, -inf  ;;  %v762_v2 = vsel %vm731_vm0, %v3901_v61, -inf }
 0x137   : > { %745 = vmax.xlane.f32.xlu0 %v744_v15  ;;  %v2974_v19 = vpop.f32.mrb[12].mxu1  ;;  %v487_v20 = vpop.f32.mrb[13].mxu0  ;;  %v822_v0 = vsel %vm731_vm0, %v3895_v57, -inf  ;;  %v3907_v1 = vmul.f32 0.088388346, %v2938_v16 }
 0x138   : > { %v652_v22 = vpop.f32.mrb[13].mxu1  ;;  %v3903_v62 = vmul.f32 0.088388346, %v2974_v19  ;;  %v3917_v10 = vmul.f32 0.088388346, %v487_v20 }
 0x139   : > { %v3911_v3 = vmul.f32 0.088388346, %v652_v22  ;;  %v771_v6 = vsel %vm731_vm0, %v3907_v1, -inf }
 0x13a   : > { %814 = vmax.xlane.f32.xlu1 %v813_v18  ;;  %v2941_v24 = vpop.f32.mrb[14].mxu0  ;;  %v831_v4 = vsel %vm731_vm0, %v3903_v62, -inf  ;;  %v768_v15 = vsel %vm731_vm0, %v3917_v10, -inf }
 0x13b   : > { %754 = vmax.xlane.f32.xlu0 %v753_v21  ;;  %v2977_v27 = vpop.f32.mrb[14].mxu1  ;;  %v497_v28 = vpop.f32.mrb[15].mxu0  ;;  %v828_v12 = vsel %vm731_vm0, %v3911_v3, -inf  ;;  %v3923_v14 = vmul.f32 0.088388346, %v2941_v24 }
 0x13c   : > { %v662_v31 = vpop.f32.mrb[15].mxu1  ;;  %v3919_v11 = vmul.f32 0.088388346, %v2977_v27  ;;  %v3933_v20 = vmul.f32 0.088388346, %v497_v28 }
 0x13d   : > { %v3927_v16 = vmul.f32 0.088388346, %v662_v31  ;;  %v777_v19 = vsel %vm731_vm0, %v3923_v14, -inf }
 0x13e   : > { %811 = vmax.xlane.f32.xlu1 %v810_v26  ;;  %v2944_v36 = vpop.f32.mrb[16].mxu0  ;;  %v837_v18 = vsel %vm731_vm0, %v3919_v11, -inf  ;;  %v774_v26 = vsel %vm731_vm0, %v3933_v20, -inf }
 0x13f   : > { %751 = vmax.xlane.f32.xlu0 %v750_v34  ;;  %v2980_v39 = vpop.f32.mrb[16].mxu1  ;;  %v507_v40 = vpop.f32.mrb[17].mxu0  ;;  %v834_v22 = vsel %vm731_vm0, %v3927_v16, -inf  ;;  %v3939_v24 = vmul.f32 0.088388346, %v2944_v36 }
 0x140   : > { %v672_v44 = vpop.f32.mrb[17].mxu1  ;;  %v3935_v21 = vmul.f32 0.088388346, %v2980_v39  ;;  %v3949_v34 = vmul.f32 0.088388346, %v507_v40 }
 0x141   : > { %v3943_v27 = vmul.f32 0.088388346, %v672_v44  ;;  %v783_v31 = vsel %vm731_vm0, %v3939_v24, -inf }
 0x142   : > { %820 = vmax.xlane.f32.xlu1 %v819_v38  ;;  %v2947_v46 = vpop.f32.mrb[18].mxu0  ;;  %v843_v28 = vsel %vm731_vm0, %v3935_v21, -inf }
 0x143   : > { %760 = vmax.xlane.f32.xlu0 %v759_v41  ;;  %v2983_v50 = vpop.f32.mrb[18].mxu1  ;;  %v517_v51 = vpop.f32.mrb[19].mxu0  ;;  %v840_v36 = vsel %vm731_vm0, %v3943_v27, -inf  ;;  %v780_v41 = vsel %vm731_vm0, %v3949_v34, -inf }
 0x144   : > { %v682_v54 = vpop.f32.mrb[19].mxu1  ;;  %v3955_v39 = vmul.f32 0.088388346, %v517_v51  ;;  %v3959_v44 = vmul.f32 0.088388346, %v2983_v50 }
 0x145   : > { %v3951_v38 = vmul.f32 0.088388346, %v682_v54  ;;  %v3965_v54 = vmul.f32 0.088388346, %v2947_v46 }
 0x146   : > { %817 = vmax.xlane.f32.xlu1 %v816_v49  ;;  %v786_v49 = vsel %vm731_vm0, %v3955_v39, -inf  ;;  %v849_v51 = vsel %vm731_vm0, %v3959_v44, -inf }
 0x147   : > { %757 = vmax.xlane.f32.xlu0 %v756_v56  ;;  %v846_v40 = vsel %vm731_vm0, %v3951_v38, -inf  ;;  %v789_v56 = vsel %vm731_vm0, %v3965_v54, -inf }
 0x14a   : > { %826 = vmax.xlane.f32.xlu1 %v825_v58 }
 0x14b   : > { %766 = vmax.xlane.f32.xlu0 %v765_v60 }
 0x14e   : > { %823 = vmax.xlane.f32.xlu1 %v822_v0 }
 0x14f   : > { %763 = vmax.xlane.f32.xlu0 %v762_v2 }
 0x152   : > { %832 = vmax.xlane.f32.xlu1 %v831_v4 }
 0x153   : > { %772 = vmax.xlane.f32.xlu0 %v771_v6 }
 0x156   : > { %829 = vmax.xlane.f32.xlu1 %v828_v12 }
 0x157   : > { %769 = vmax.xlane.f32.xlu0 %v768_v15 }
 0x15a   : > { %838 = vmax.xlane.f32.xlu1 %v837_v18 }
 0x15b   : > { %778 = vmax.xlane.f32.xlu0 %v777_v19 }
 0x15e   : > { %835 = vmax.xlane.f32.xlu1 %v834_v22 }
 0x15f   : > { %775 = vmax.xlane.f32.xlu0 %v774_v26 }
 0x162   : > { %844 = vmax.xlane.f32.xlu1 %v843_v28 }
 0x163   : > { %784 = vmax.xlane.f32.xlu0 %v783_v31 }
 0x166   : > { %841 = vmax.xlane.f32.xlu1 %v840_v36 }
 0x167   : > { %781 = vmax.xlane.f32.xlu0 %v780_v41 }
 0x16a   : > { %847 = vmax.xlane.f32.xlu1 %v846_v40 }
 0x16b   : > { %787 = vmax.xlane.f32.xlu0 %v786_v49 }
 0x16e   : > { %850 = vmax.xlane.f32.xlu1 %v849_v51 }
 0x16f   : > { %790 = vmax.xlane.f32.xlu0 %v789_v56 }
 0x1af   : > { %v737_v46 = vpop.xlane.xlu1 %736 }
 0x1b0   : > { %v853_v50 = vsub.f32 %v3811_v29, %v737_v46  ;;  %v734_v58 = vpop.xlane.xlu0 %733 }
 0x1b1   : > { %v852_v60 = vsub.f32 %v3813_v32, %v734_v58 }
 0x1b2   : > { %v894_v0 = vmul.f32 1.442695, %v853_v50 }
 0x1b3   : > { %v892_v2 = vmul.f32 1.442695, %v852_v60  ;;  %v797_v4 = vpop.xlane.xlu1 %796 }
 0x1b4   : > { %3212 = vpow2.f32 %v894_v0  ;;  %v873_v6 = vsub.f32 %v3815_v33, %v797_v4  ;;  %v794_v12 = vpop.xlane.xlu0 %793 }
 0x1b5   : > { %v872_v15 = vsub.f32 %v3817_v35, %v794_v12  ;;  %3214 = vpow2.f32 %v892_v2 }
 0x1b6   : > { %v934_v7 = vmul.f32 1.442695, %v873_v6 }
 0x1b7   : > { %v932_v18 = vmul.f32 1.442695, %v872_v15  ;;  %v803_v19 = vpop.xlane.xlu1 %802 }
 0x1b8   : > { %3216 = vpow2.f32 %v934_v7  ;;  %v875_v8 = vsub.f32 %v3825_v42, %v803_v19  ;;  %v743_v29 = vpop.xlane.xlu0 %742 }
 0x1b9   : > { %v855_v22 = vsub.f32 %v3827_v43, %v743_v29  ;;  %3218 = vpow2.f32 %v932_v18 }
 0x1ba   : > { %v938_v32 = vmul.f32 1.442695, %v875_v8 }
 0x1bb   : > { %v898_v26 = vmul.f32 1.442695, %v855_v22  ;;  %v800_v28 = vpop.xlane.xlu1 %799 }
 0x1bc   : > { %v874_v31 = vsub.f32 %v3831_v47, %v800_v28  ;;  %v740_v33 = vpop.xlane.xlu0 %739 }
 0x1bd   : > { %3220 = vpow2.f32 %v898_v26  ;;  %v854_v35 = vsub.f32 %v3837_v53, %v740_v33 }
 0x1be   : > { %v3987_v36 = vpop.eup %3212  ;;  %3222 = vpow2.f32 %v938_v32  ;;  %v936_v41 = vmul.f32 1.442695, %v874_v31 }
 0x1bf   : > { %v896_v40 = vmul.f32 1.442695, %v854_v35  ;;  %v809_v49 = vpop.xlane.xlu1 %808  ;;  %v975_v42 = vsel %vm731_vm0, %v3987_v36, 0.0  ;;  %v3991_v43 = vpop.eup %3214 }
 0x1c0   : > { %v877_v51 = vsub.f32 %v3839_v55, %v809_v49  ;;  %v749_v56 = vpop.xlane.xlu0 %748  ;;  %976 = vadd.xlane.f32.xlu0 %v975_v42  ;;  %v972_v0 = vsel %vm731_vm0, %v3991_v43, 0.0 }
 0x1c1   : > { %3224 = vpow2.f32 %v896_v40  ;;  %v857_v47 = vsub.f32 %v3843_v59, %v749_v56 }
 0x1c2   : > { %v3995_v46 = vpop.eup %3216  ;;  %3226 = vpow2.f32 %v936_v41  ;;  %v942_v53 = vmul.f32 1.442695, %v877_v51 }
 0x1c3   : > { %v902_v50 = vmul.f32 1.442695, %v857_v47  ;;  %v806_v58 = vpop.xlane.xlu1 %805  ;;  %v1035_v60 = vsel %vm731_vm0, %v3995_v46, 0.0  ;;  %v4001_v2 = vpop.eup %3218 }
 0x1c4   : > { %v876_v55 = vsub.f32 %v3847_v63, %v806_v58  ;;  %1036 = vadd.xlane.f32.xlu1 %v1035_v60  ;;  %v746_v4 = vpop.xlane.xlu0 %745  ;;  %973 = vadd.xlane.f32.xlu0 %v972_v0  ;;  %v1032_v18 = vsel %vm731_vm0, %v4001_v2, 0.0 }
 0x1c5   : > { %3228 = vpow2.f32 %v902_v50  ;;  %v856_v59 = vsub.f32 %v3853_v5, %v746_v4 }
 0x1c6   : > { %3230 = vpow2.f32 %v942_v53  ;;  %v940_v6 = vmul.f32 1.442695, %v876_v55 }
 0x1c7   : > { %v4005_v12 = vpop.eup %3220  ;;  %v900_v15 = vmul.f32 1.442695, %v856_v59  ;;  %v815_v7 = vpop.xlane.xlu1 %814 }
 0x1c8   : > { %v4009_v19 = vpop.eup %3222  ;;  %v879_v8 = vsub.f32 %v3855_v9, %v815_v7  ;;  %1033 = vadd.xlane.f32.xlu1 %v1032_v18  ;;  %v755_v63 = vpop.xlane.xlu0 %754  ;;  %v981_v29 = vsel %vm731_vm0, %v4005_v12, 0.0 }
 0x1c9   : > { %3232 = vpow2.f32 %v900_v15  ;;  %v859_v5 = vsub.f32 %v3859_v13, %v755_v63  ;;  %982 = vadd.xlane.f32.xlu0 %v981_v29  ;;  %v1041_v31 = vsel %vm731_vm0, %v4009_v19, 0.0 }
 0x1ca   : > { %3234 = vpow2.f32 %v940_v6  ;;  %v946_v22 = vmul.f32 1.442695, %v879_v8 }
 0x1cb   : > { %v4015_v32 = vpop.eup %3224  ;;  %v906_v26 = vmul.f32 1.442695, %v859_v5  ;;  %v812_v28 = vpop.xlane.xlu1 %811 }
 0x1cc   : > { %v4019_v33 = vpop.eup %3226  ;;  %v878_v9 = vsub.f32 %v3863_v17, %v812_v28  ;;  %1042 = vadd.xlane.f32.xlu1 %v1041_v31  ;;  %v752_v35 = vpop.xlane.xlu0 %751  ;;  %v978_v41 = vsel %vm731_vm0, %v4015_v32, 0.0 }
 0x1cd   : > { %3236 = vpow2.f32 %v906_v26  ;;  %v858_v13 = vsub.f32 %v3869_v23, %v752_v35  ;;  %979 = vadd.xlane.f32.xlu0 %v978_v41  ;;  %v1038_v56 = vsel %vm731_vm0, %v4019_v33, 0.0 }
 0x1ce   : > { %3238 = vpow2.f32 %v946_v22  ;;  %v944_v40 = vmul.f32 1.442695, %v878_v9 }
 0x1cf   : > { %v4025_v49 = vpop.eup %3228  ;;  %v904_v42 = vmul.f32 1.442695, %v858_v13  ;;  %v821_v51 = vpop.xlane.xlu1 %820 }
 0x1d0   : > { %v4029_v47 = vpop.eup %3230  ;;  %v881_v17 = vsub.f32 %v3871_v25, %v821_v51  ;;  %1039 = vadd.xlane.f32.xlu1 %v1038_v56  ;;  %v761_v53 = vpop.xlane.xlu0 %760  ;;  %v987_v50 = vsel %vm731_vm0, %v4025_v49, 0.0 }
 0x1d1   : > { %3240 = vpow2.f32 %v904_v42  ;;  %v861_v23 = vsub.f32 %v3875_v30, %v761_v53  ;;  %988 = vadd.xlane.f32.xlu0 %v987_v50  ;;  %v1047_v4 = vsel %vm731_vm0, %v4029_v47, 0.0 }
 0x1d2   : > { %3242 = vpow2.f32 %v944_v40  ;;  %v950_v58 = vmul.f32 1.442695, %v881_v17 }
 0x1d3   : > { %v4035_v60 = vpop.eup %3232  ;;  %v910_v0 = vmul.f32 1.442695, %v861_v23  ;;  %v818_v55 = vpop.xlane.xlu1 %817 }
 0x1d4   : > { %v4039_v59 = vpop.eup %3234  ;;  %v880_v25 = vsub.f32 %v3879_v37, %v818_v55  ;;  %1048 = vadd.xlane.f32.xlu1 %v1047_v4  ;;  %v758_v6 = vpop.xlane.xlu0 %757  ;;  %v984_v15 = vsel %vm731_vm0, %v4035_v60, 0.0 }
 0x1d5   : > { %3244 = vpow2.f32 %v910_v0  ;;  %v860_v30 = vsub.f32 %v3885_v45, %v758_v6  ;;  %985 = vadd.xlane.f32.xlu0 %v984_v15  ;;  %v1044_v29 = vsel %vm731_vm0, %v4039_v59, 0.0 }
 0x1d6   : > { %3246 = vpow2.f32 %v950_v58  ;;  %v948_v7 = vmul.f32 1.442695, %v880_v25 }
 0x1d7   : > { %v4045_v18 = vpop.eup %3236  ;;  %v908_v8 = vmul.f32 1.442695, %v860_v30  ;;  %v827_v63 = vpop.xlane.xlu1 %826 }
 0x1d8   : > { %v4049_v5 = vpop.eup %3238  ;;  %v883_v37 = vsub.f32 %v3887_v48, %v827_v63  ;;  %1045 = vadd.xlane.f32.xlu1 %v1044_v29  ;;  %v767_v22 = vpop.xlane.xlu0 %766  ;;  %v993_v26 = vsel %vm731_vm0, %v4045_v18, 0.0 }
 0x1d9   : > { %3248 = vpow2.f32 %v908_v8  ;;  %v863_v45 = vsub.f32 %v3891_v52, %v767_v22  ;;  %994 = vadd.xlane.f32.xlu0 %v993_v26  ;;  %v1053_v41 = vsel %vm731_vm0, %v4049_v5, 0.0 }
 0x1da   : > { %3250 = vpow2.f32 %v948_v7  ;;  %v954_v28 = vmul.f32 1.442695, %v883_v37 }
 0x1db   : > { %v4055_v31 = vpop.eup %3240  ;;  %v914_v9 = vmul.f32 1.442695, %v863_v45  ;;  %v824_v35 = vpop.xlane.xlu1 %823 }
 0x1dc   : > { %v4059_v13 = vpop.eup %3242  ;;  %v882_v48 = vsub.f32 %v3895_v57, %v824_v35  ;;  %1054 = vadd.xlane.f32.xlu1 %v1053_v41  ;;  %v764_v40 = vpop.xlane.xlu0 %763  ;;  %v990_v42 = vsel %vm731_vm0, %v4055_v31, 0.0 }
 0x1dd   : > { %3252 = vpow2.f32 %v914_v9  ;;  %v862_v52 = vsub.f32 %v3901_v61, %v764_v40  ;;  %991 = vadd.xlane.f32.xlu0 %v990_v42  ;;  %v1050_v50 = vsel %vm731_vm0, %v4059_v13, 0.0 }
 0x1de   : > { %3254 = vpow2.f32 %v954_v28  ;;  %v952_v51 = vmul.f32 1.442695, %v882_v48 }
 0x1df   : > { %v4065_v56 = vpop.eup %3244  ;;  %v912_v17 = vmul.f32 1.442695, %v862_v52  ;;  %v833_v53 = vpop.xlane.xlu1 %832 }
 0x1e0   : > { %v4069_v23 = vpop.eup %3246  ;;  %v885_v57 = vsub.f32 %v3903_v62, %v833_v53  ;;  %1051 = vadd.xlane.f32.xlu1 %v1050_v50  ;;  %v773_v58 = vpop.xlane.xlu0 %772  ;;  %v999_v0 = vsel %vm731_vm0, %v4065_v56, 0.0 }
 0x1e1   : > { %3256 = vpow2.f32 %v912_v17  ;;  %v865_v61 = vsub.f32 %v3907_v1, %v773_v58  ;;  %1000 = vadd.xlane.f32.xlu0 %v999_v0  ;;  %v1059_v15 = vsel %vm731_vm0, %v4069_v23, 0.0 }
 0x1e2   : > { %3258 = vpow2.f32 %v952_v51  ;;  %v958_v55 = vmul.f32 1.442695, %v885_v57 }
 0x1e3   : > { %v4075_v4 = vpop.eup %3248  ;;  %v918_v25 = vmul.f32 1.442695, %v865_v61  ;;  %v830_v6 = vpop.xlane.xlu1 %829 }
 0x1e4   : > { %v4079_v30 = vpop.eup %3250  ;;  %v884_v62 = vsub.f32 %v3911_v3, %v830_v6  ;;  %1060 = vadd.xlane.f32.xlu1 %v1059_v15  ;;  %v770_v7 = vpop.xlane.xlu0 %769  ;;  %v996_v8 = vsel %vm731_vm0, %v4075_v4, 0.0 }
 0x1e5   : > { %3260 = vpow2.f32 %v918_v25  ;;  %v864_v1 = vsub.f32 %v3917_v10, %v770_v7  ;;  %997 = vadd.xlane.f32.xlu0 %v996_v8  ;;  %v1056_v26 = vsel %vm731_vm0, %v4079_v30, 0.0 }
 0x1e6   : > { %3262 = vpow2.f32 %v958_v55  ;;  %v956_v63 = vmul.f32 1.442695, %v884_v62 }
 0x1e7   : > { %v4085_v29 = vpop.eup %3252  ;;  %v916_v37 = vmul.f32 1.442695, %v864_v1  ;;  %v839_v22 = vpop.xlane.xlu1 %838 }
 0x1e8   : > { %v4089_v45 = vpop.eup %3254  ;;  %v887_v3 = vsub.f32 %v3919_v11, %v839_v22  ;;  %1057 = vadd.xlane.f32.xlu1 %v1056_v26  ;;  %v779_v28 = vpop.xlane.xlu0 %778  ;;  %v1005_v9 = vsel %vm731_vm0, %v4085_v29, 0.0 }
 0x1e9   : > { %3264 = vpow2.f32 %v916_v37  ;;  %v867_v10 = vsub.f32 %v3923_v14, %v779_v28  ;;  %1006 = vadd.xlane.f32.xlu0 %v1005_v9  ;;  %v1065_v42 = vsel %vm731_vm0, %v4089_v45, 0.0 }
 0x1ea   : > { %3266 = vpow2.f32 %v956_v63  ;;  %v962_v35 = vmul.f32 1.442695, %v887_v3 }
 0x1eb   : > { %v4095_v41 = vpop.eup %3256  ;;  %v922_v48 = vmul.f32 1.442695, %v867_v10  ;;  %v836_v40 = vpop.xlane.xlu1 %835 }
 0x1ec   : > { %v4099_v52 = vpop.eup %3258  ;;  %v886_v11 = vsub.f32 %v3927_v16, %v836_v40  ;;  %1066 = vadd.xlane.f32.xlu1 %v1065_v42  ;;  %v776_v51 = vpop.xlane.xlu0 %775  ;;  %v1002_v17 = vsel %vm731_vm0, %v4095_v41, 0.0 }
 0x1ed   : > { %3268 = vpow2.f32 %v922_v48  ;;  %v866_v14 = vsub.f32 %v3933_v20, %v776_v51  ;;  %1003 = vadd.xlane.f32.xlu0 %v1002_v17  ;;  %v1062_v0 = vsel %vm731_vm0, %v4099_v52, 0.0 }
 0x1ee   : > { %3270 = vpow2.f32 %v962_v35  ;;  %v960_v53 = vmul.f32 1.442695, %v886_v11 }
 0x1ef   : > { %v4105_v50 = vpop.eup %3260  ;;  %v920_v57 = vmul.f32 1.442695, %v866_v14  ;;  %v845_v58 = vpop.xlane.xlu1 %844 }
 0x1f0   : > { %v4109_v61 = vpop.eup %3262  ;;  %v889_v16 = vsub.f32 %v3935_v21, %v845_v58  ;;  %1063 = vadd.xlane.f32.xlu1 %v1062_v0  ;;  %v785_v55 = vpop.xlane.xlu0 %784  ;;  %v1011_v25 = vsel %vm731_vm0, %v4105_v50, 0.0 }
 0x1f1   : > { %3272 = vpow2.f32 %v920_v57  ;;  %v869_v20 = vsub.f32 %v3939_v24, %v785_v55  ;;  %1012 = vadd.xlane.f32.xlu0 %v1011_v25  ;;  %v1071_v8 = vsel %vm731_vm0, %v4109_v61, 0.0 }
 0x1f2   : > { %3274 = vpow2.f32 %v960_v53  ;;  %v966_v6 = vmul.f32 1.442695, %v889_v16 }
 0x1f3   : > { %v4115_v15 = vpop.eup %3264  ;;  %v926_v62 = vmul.f32 1.442695, %v869_v20  ;;  %v842_v7 = vpop.xlane.xlu1 %841 }
 0x1f4   : > { %v4119_v1 = vpop.eup %3266  ;;  %v888_v21 = vsub.f32 %v3943_v27, %v842_v7  ;;  %1072 = vadd.xlane.f32.xlu1 %v1071_v8  ;;  %v782_v63 = vpop.xlane.xlu0 %781  ;;  %v1008_v37 = vsel %vm731_vm0, %v4115_v15, 0.0 }
 0x1f5   : > { %3276 = vpow2.f32 %v926_v62  ;;  %v868_v24 = vsub.f32 %v3949_v34, %v782_v63  ;;  %1009 = vadd.xlane.f32.xlu0 %v1008_v37  ;;  %v1068_v9 = vsel %vm731_vm0, %v4119_v1, 0.0 }
 0x1f6   : > { %3278 = vpow2.f32 %v966_v6  ;;  %v964_v22 = vmul.f32 1.442695, %v888_v21 }
 0x1f7   : > { %v4125_v26 = vpop.eup %3268  ;;  %v924_v3 = vmul.f32 1.442695, %v868_v24  ;;  %v848_v28 = vpop.xlane.xlu1 %847 }
 0x1f8   : > { %v4129_v10 = vpop.eup %3270  ;;  %v890_v27 = vsub.f32 %v3951_v38, %v848_v28  ;;  %1069 = vadd.xlane.f32.xlu1 %v1068_v9  ;;  %v788_v35 = vpop.xlane.xlu0 %787  ;;  %v1017_v48 = vsel %vm731_vm0, %v4125_v26, 0.0  ;;  %v4180_v9 = vld [vmem:[%s3735_s15] sm:$0xff] }
 0x1f9   : > { %3280 = vpow2.f32 %v924_v3  ;;  %v870_v34 = vsub.f32 %v3955_v39, %v788_v35  ;;  %1018 = vadd.xlane.f32.xlu0 %v1017_v48  ;;  %v1077_v17 = vsel %vm731_vm0, %v4129_v10, 0.0  ;;  %v3474_v35 = vld [vmem:[%s3735_s15 + $0x18] sm:$0xff]  ;;  %v3475_v48 = vld [vmem:[%s3735_s15 + $0x20] sm:$0xff] }
 0x1fa   : > { %3282 = vpow2.f32 %v964_v22  ;;  %v968_v40 = vmul.f32 1.442695, %v890_v27  ;;  %v4184_v27 = vld [vmem:[%s3735_s15 + $0x8] sm:$0xff] }
 0x1fb   : > { %v4135_v42 = vpop.eup %3272  ;;  %v928_v11 = vmul.f32 1.442695, %v870_v34  ;;  %v851_v51 = vpop.xlane.xlu1 %850  ;;  %v3476_v34 = vld [vmem:[%s3735_s15 + $0x10] sm:$0x1] }
 0x1fc   : > { %v4139_v14 = vpop.eup %3274  ;;  %v891_v38 = vsub.f32 %v3959_v44, %v851_v51  ;;  %1078 = vadd.xlane.f32.xlu1 %v1077_v17  ;;  %v791_v53 = vpop.xlane.xlu0 %790  ;;  %v1014_v57 = vsel %vm731_vm0, %v4135_v42, 0.0 }
 0x1fd   : > { %3284 = vpow2.f32 %v928_v11  ;;  %v871_v39 = vsub.f32 %v3965_v54, %v791_v53  ;;  %1015 = vadd.xlane.f32.xlu0 %v1014_v57  ;;  %v1074_v55 = vsel %vm731_vm0, %v4139_v14, 0.0  ;;  %v3477_v11 = vld [vmem:[%s3735_s15 + $0x28] sm:$0x1] }
 0x1fe   : > { %3286 = vpow2.f32 %v968_v40  ;;  %v970_v58 = vmul.f32 1.442695, %v891_v38  ;;  %v2350_v40 = vsel %vm1232_vm1, %v3476_v34, 0.0  ;;  %v2357_v51 = vsel %vm1232_vm1, %v3477_v11, 0.0 }
 0x1ff   : > { %v4145_v0 = vpop.eup %3276  ;;  %v930_v16 = vmul.f32 1.442695, %v871_v39 }
 0x200   : > { %v4149_v25 = vpop.eup %3278  ;;  %1075 = vadd.xlane.f32.xlu1 %v1074_v55  ;;  %v1023_v44 = vsel %vm731_vm0, %v4145_v0, 0.0 }
 0x201   : > { %3288 = vpow2.f32 %v930_v16  ;;  %1024 = vadd.xlane.f32.xlu0 %v1023_v44  ;;  %v1083_v54 = vsel %vm731_vm0, %v4149_v25, 0.0 }
 0x202   : > { %3290 = vpow2.f32 %v970_v58 }
 0x203   : > { %v4153_v20 = vpop.eup %3280 }
 0x204   : > { %v4157_v6 = vpop.eup %3282  ;;  %1084 = vadd.xlane.f32.xlu1 %v1083_v54  ;;  %v1020_v62 = vsel %vm731_vm0, %v4153_v20, 0.0 }
 0x205   : > { %1021 = vadd.xlane.f32.xlu0 %v1020_v62  ;;  %v1080_v8 = vsel %vm731_vm0, %v4157_v6, 0.0 }
 0x207   : > { %v4161_v7 = vpop.eup %3284 }
 0x208   : > { %v4165_v21 = vpop.eup %3286  ;;  %1081 = vadd.xlane.f32.xlu1 %v1080_v8  ;;  %v1026_v63 = vsel %vm731_vm0, %v4161_v7, 0.0 }
 0x209   : > { %1027 = vadd.xlane.f32.xlu0 %v1026_v63  ;;  %v1086_v24 = vsel %vm731_vm0, %v4165_v21, 0.0 }
 0x20b   : > { %v4169_v37 = vpop.eup %3288 }
 0x20c   : > { %v4173_v22 = vpop.eup %3290  ;;  %1087 = vadd.xlane.f32.xlu1 %v1086_v24  ;;  %v1029_v3 = vsel %vm731_vm0, %v4169_v37, 0.0 }
 0x20d   : > { %1030 = vadd.xlane.f32.xlu0 %v1029_v3  ;;  %v1089_v28 = vsel %vm731_vm0, %v4173_v22, 0.0 }
 0x210   : > { %1090 = vadd.xlane.f32.xlu1 %v1089_v28 }
 0x211   : > { %2346 = vadd.xlane.f32.xlu0 %v4180_v9 }
 0x214   : > { %2348 = vadd.xlane.f32.xlu1 %v4184_v27 }
 0x215   : > { %2353 = vadd.xlane.f32.xlu0 %v3474_v35 }
 0x218   : > { %2355 = vadd.xlane.f32.xlu1 %v3475_v48 }
 0x219   : > { %2351 = vadd.xlane.f32.xlu0 %v2350_v40 }
 0x21c   : > { %2358 = vadd.xlane.f32.xlu1 %v2357_v51 }
 0x24d   : > { %v977_v17 = vpop.xlane.xlu0 %976 }
 0x24e   : > { %3292 = vrcp.f32 %v977_v17 }
 0x251   : > { %v1037_v38 = vpop.xlane.xlu1 %1036  ;;  %v974_v53 = vpop.xlane.xlu0 %973 }
 0x252   : > { %3294 = vrcp.f32 %v974_v53 }
 0x253   : > { %3296 = vrcp.f32 %v1037_v38 }
 0x255   : > { %v1034_v57 = vpop.xlane.xlu1 %1033 }
 0x256   : > { %3298 = vrcp.f32 %v1034_v57  ;;  %v983_v39 = vpop.xlane.xlu0 %982 }
 0x257   : > { %3300 = vrcp.f32 %v983_v39 }
 0x258   : > { %v3293_v55 = vpop.eup %3292 }
 0x259   : > { %v1043_v58 = vpop.xlane.xlu1 %1042  ;;  %v1133_v24 = vmul.f32 %v3293_v55, %v3987_v36 }
 0x25a   : > { %v980_v16 = vpop.xlane.xlu0 %979 }
 0x25b   : > { %3302 = vrcp.f32 %v980_v16 }
 0x25c   : > { %v3295_v44 = vpop.eup %3294  ;;  %3304 = vrcp.f32 %v1043_v58 }
 0x25d   : > { %v1040_v54 = vpop.xlane.xlu1 %1039  ;;  %v1132_v8 = vmul.f32 %v3295_v44, %v3991_v43  ;;  %v3297_v63 = vpop.eup %3296 }
 0x25e   : > { %3306 = vrcp.f32 %v1040_v54  ;;  %v989_v62 = vpop.xlane.xlu0 %988  ;;  %v1153_v48 = vmul.f32 %v3297_v63, %v3995_v46 }
 0x25f   : > { %2990 = vmatprep.mubr.msk.f32.mxu0 %vm731_vm0, %v1132_v8  ;;  %3308 = vrcp.f32 %v989_v62 }
 0x260   : > { %v3299_v3 = vpop.eup %3298  ;;  %2991 = vmatmul.mubr.msk.f32.vlgmr.msra.gmra.mrb[20].mxu0 %vm731_vm0, %v1133_v24 }
 0x261   : > { %v1049_v28 = vpop.xlane.xlu1 %1048  ;;  %v1152_v35 = vmul.f32 %v3299_v3, %v4001_v2  ;;  %v3301_v40 = vpop.eup %3300 }
 0x262   : > { %v986_v34 = vpop.xlane.xlu0 %985  ;;  %v1135_v2 = vmul.f32 %v3301_v40, %v4005_v12 }
 0x263   : > { %3310 = vrcp.f32 %v986_v34  ;;  %3026 = vmatprep.mubr.msk.f32.mxu1 %vm731_vm0, %v1152_v35 }
 0x264   : > { %3027 = vmatmul.mubr.msk.f32.vlgmr.msra.gmra.mrb[20].mxu1 %vm731_vm0, %v1153_v48  ;;  %3312 = vrcp.f32 %v1049_v28 }
 0x265   : > { %v3303_v43 = vpop.eup %3302  ;;  %v1046_v36 = vpop.xlane.xlu1 %1045 }
 0x266   : > { %3314 = vrcp.f32 %v1046_v36  ;;  %v995_v11 = vpop.xlane.xlu0 %994  ;;  %v1134_v51 = vmul.f32 %v3303_v43, %v4015_v32  ;;  %v3305_v17 = vpop.eup %3304 }
 0x267   : > { %3316 = vrcp.f32 %v995_v11  ;;  %v1155_v39 = vmul.f32 %v3305_v17, %v4009_v19 }
 0x268   : > { %v3307_v38 = vpop.eup %3306  ;;  %2993 = vmatprep.mubr.msk.f32.mxu0 %vm731_vm0, %v1134_v51 }
 0x269   : > { %v1055_v46 = vpop.xlane.xlu1 %1054  ;;  %2994 = vmatmul.mubr.msk.f32.gmra.mrb[22].mxu0 %vm731_vm0, %v1135_v2  ;;  %v1154_v53 = vmul.f32 %v3307_v38, %v4019_v33  ;;  %v3309_v58 = vpop.eup %3308 }
 0x26a   : > { %v992_v57 = vpop.xlane.xlu0 %991  ;;  %v1137_v33 = vmul.f32 %v3309_v58, %v4025_v49 }
 0x26b   : > { %3318 = vrcp.f32 %v992_v57  ;;  %3029 = vmatprep.mubr.msk.f32.mxu1 %vm731_vm0, %v1154_v53 }
 0x26c   : > { %3030 = vmatmul.mubr.msk.f32.gmra.mrb[22].mxu1 %vm731_vm0, %v1155_v39  ;;  %3320 = vrcp.f32 %v1055_v46 }
 0x26d   : > { %v3311_v32 = vpop.eup %3310  ;;  %v1052_v12 = vpop.xlane.xlu1 %1051 }
 0x26e   : > { %3322 = vrcp.f32 %v1052_v12  ;;  %v1001_v16 = vpop.xlane.xlu0 %1000  ;;  %v1136_v55 = vmul.f32 %v3311_v32, %v4035_v60  ;;  %v3313_v44 = vpop.eup %3312 }
 0x26f   : > { %3324 = vrcp.f32 %v1001_v16  ;;  %v1157_v63 = vmul.f32 %v3313_v44, %v4029_v47 }
 0x270   : > { %v3315_v54 = vpop.eup %3314  ;;  %2996 = vmatprep.mubr.msk.f32.mxu0 %vm731_vm0, %v1136_v55 }
 0x271   : > { %v1061_v19 = vpop.xlane.xlu1 %1060  ;;  %2997 = vmatmul.mubr.msk.f32.gmra.mrb[24].mxu0 %vm731_vm0, %v1137_v33  ;;  %v1156_v62 = vmul.f32 %v3315_v54, %v4039_v59  ;;  %v3317_v24 = vpop.eup %3316 }
 0x272   : > { %v998_v8 = vpop.xlane.xlu0 %997  ;;  %v1139_v59 = vmul.f32 %v3317_v24, %v4045_v18 }
 0x273   : > { %3326 = vrcp.f32 %v998_v8  ;;  %3032 = vmatprep.mubr.msk.f32.mxu1 %vm731_vm0, %v1156_v62 }
 0x274   : > { %3033 = vmatmul.mubr.msk.f32.gmra.mrb[24].mxu1 %vm731_vm0, %v1157_v63  ;;  %3328 = vrcp.f32 %v1061_v19 }
 0x275   : > { %v3319_v60 = vpop.eup %3318  ;;  %v1058_v49 = vpop.xlane.xlu1 %1057 }
 0x276   : > { %3330 = vrcp.f32 %v1058_v49  ;;  %v1007_v3 = vpop.xlane.xlu0 %1006  ;;  %v1138_v28 = vmul.f32 %v3319_v60, %v4055_v31  ;;  %v3321_v35 = vpop.eup %3320 }
 0x277   : > { %3332 = vrcp.f32 %v1007_v3  ;;  %v1159_v43 = vmul.f32 %v3321_v35, %v4049_v5 }
 0x278   : > { %v3323_v48 = vpop.eup %3322  ;;  %2999 = vmatprep.mubr.msk.f32.mxu0 %vm731_vm0, %v1138_v28 }
 0x279   : > { %v1067_v47 = vpop.xlane.xlu1 %1066  ;;  %3000 = vmatmul.mubr.msk.f32.gmra.mrb[26].mxu0 %vm731_vm0, %v1139_v59  ;;  %v1158_v34 = vmul.f32 %v3323_v48, %v4059_v13  ;;  %v3325_v36 = vpop.eup %3324 }
 0x27a   : > { %v1004_v40 = vpop.xlane.xlu0 %1003  ;;  %v1141_v13 = vmul.f32 %v3325_v36, %v4065_v56 }
 0x27b   : > { %3334 = vrcp.f32 %v1004_v40  ;;  %3035 = vmatprep.mubr.msk.f32.mxu1 %vm731_vm0, %v1158_v34 }
 0x27c   : > { %3036 = vmatmul.mubr.msk.f32.gmra.mrb[26].mxu1 %vm731_vm0, %v1159_v43  ;;  %3336 = vrcp.f32 %v1067_v47 }
 0x27d   : > { %v3327_v31 = vpop.eup %3326  ;;  %v1064_v18 = vpop.xlane.xlu1 %1063 }
 0x27e   : > { %3338 = vrcp.f32 %v1064_v18  ;;  %v1013_v11 = vpop.xlane.xlu0 %1012  ;;  %v1140_v51 = vmul.f32 %v3327_v31, %v4075_v4  ;;  %v3329_v17 = vpop.eup %3328 }
 0x27f   : > { %3340 = vrcp.f32 %v1013_v11  ;;  %v1161_v53 = vmul.f32 %v3329_v17, %v4069_v23 }
 0x280   : > { %v3331_v2 = vpop.eup %3330  ;;  %3002 = vmatprep.mubr.msk.f32.mxu0 %vm731_vm0, %v1140_v51 }
 0x281   : > { %v1073_v5 = vpop.xlane.xlu1 %1072  ;;  %3003 = vmatmul.mubr.msk.f32.gmra.mrb[28].mxu0 %vm731_vm0, %v1141_v13  ;;  %v1160_v38 = vmul.f32 %v3331_v2, %v4079_v30  ;;  %v3333_v57 = vpop.eup %3332 }
 0x282   : > { %v1010_v46 = vpop.xlane.xlu0 %1009  ;;  %v1143_v30 = vmul.f32 %v3333_v57, %v4085_v29 }
 0x283   : > { %3342 = vrcp.f32 %v1010_v46  ;;  %3038 = vmatprep.mubr.msk.f32.mxu1 %vm731_vm0, %v1160_v38 }
 0x284   : > { %3039 = vmatmul.mubr.msk.f32.gmra.mrb[28].mxu1 %vm731_vm0, %v1161_v53  ;;  %3344 = vrcp.f32 %v1073_v5 }
 0x285   : > { %v3335_v4 = vpop.eup %3334  ;;  %v1070_v56 = vpop.xlane.xlu1 %1069 }
 0x286   : > { %3346 = vrcp.f32 %v1070_v56  ;;  %v1019_v39 = vpop.xlane.xlu0 %1018  ;;  %v1142_v58 = vmul.f32 %v3335_v4, %v4095_v41  ;;  %v3337_v32 = vpop.eup %3336 }
 0x287   : > { %3348 = vrcp.f32 %v1019_v39  ;;  %v1163_v44 = vmul.f32 %v3337_v32, %v4089_v45 }
 0x288   : > { %v3339_v12 = vpop.eup %3338  ;;  %3005 = vmatprep.mubr.msk.f32.mxu0 %vm731_vm0, %v1142_v58 }
 0x289   : > { %v1079_v23 = vpop.xlane.xlu1 %1078  ;;  %3006 = vmatmul.mubr.msk.f32.gmra.mrb[30].mxu0 %vm731_vm0, %v1143_v30  ;;  %v1162_v16 = vmul.f32 %v3339_v12, %v4099_v52  ;;  %v3341_v33 = vpop.eup %3340 }
 0x28a   : > { %v1016_v55 = vpop.xlane.xlu0 %1015  ;;  %v1145_v52 = vmul.f32 %v3341_v33, %v4105_v50 }
 0x28b   : > { %3350 = vrcp.f32 %v1016_v55  ;;  %3041 = vmatprep.mubr.msk.f32.mxu1 %vm731_vm0, %v1162_v16 }
 0x28c   : > { %3042 = vmatmul.mubr.msk.f32.gmra.mrb[30].mxu1 %vm731_vm0, %v1163_v44  ;;  %3352 = vrcp.f32 %v1079_v23  ;;  %v3480_v23 = vld [vmem:[%s4943_s0 + $0x18] sm:$0xff]  ;;  %v3481_v44 = vld [vmem:[%s4943_s0 + $0x10] sm:$0xff] }
 0x28d   : > { %v3343_v41 = vpop.eup %3342  ;;  %v1076_v29 = vpop.xlane.xlu1 %1075 }
 0x28e   : > { %3354 = vrcp.f32 %v1076_v29  ;;  %v1025_v54 = vpop.xlane.xlu0 %1024  ;;  %v1144_v19 = vmul.f32 %v3343_v41, %v4115_v15  ;;  %v3345_v62 = vpop.eup %3344 }
 0x28f   : > { %3356 = vrcp.f32 %v1025_v54  ;;  %v1165_v60 = vmul.f32 %v3345_v62, %v4109_v61 }
 0x290   : > { %v3347_v8 = vpop.eup %3346  ;;  %3008 = vmatprep.mubr.msk.f32.mxu0 %vm731_vm0, %v1144_v19 }
 0x291   : > { %v1085_v45 = vpop.xlane.xlu1 %1084  ;;  %3009 = vmatmul.mubr.msk.f32.gmra.mrb[32].mxu0 %vm731_vm0, %v1145_v52  ;;  %v1164_v63 = vmul.f32 %v3347_v8, %v4119_v1  ;;  %v3349_v49 = vpop.eup %3348  ;;  %v3482_v52 = vld [vmem:[%s4943_s0 + $0x28] sm:$0xff] }
 0x292   : > { %v1022_v24 = vpop.xlane.xlu0 %1021  ;;  %v1147_v1 = vmul.f32 %v3349_v49, %v4125_v26 }
 0x293   : > { %3358 = vrcp.f32 %v1022_v24  ;;  %3044 = vmatprep.mubr.msk.f32.mxu1 %vm731_vm0, %v1164_v63  ;;  %v3483_v63 = vld [vmem:[%s4943_s0 + $0x20] sm:$0xff] }
 0x294   : > { %3045 = vmatmul.mubr.msk.f32.gmra.mrb[32].mxu1 %vm731_vm0, %v1165_v60  ;;  %3360 = vrcp.f32 %v1085_v45 }
 0x295   : > { %v3351_v15 = vpop.eup %3350  ;;  %v1082_v50 = vpop.xlane.xlu1 %1081 }
 0x296   : > { %3362 = vrcp.f32 %v1082_v50  ;;  %v1028_v3 = vpop.xlane.xlu0 %1027  ;;  %v1146_v28 = vmul.f32 %v3351_v15, %v4135_v42  ;;  %v3353_v35 = vpop.eup %3352 }
 0x297   : > { %3364 = vrcp.f32 %v1028_v3  ;;  %v1167_v34 = vmul.f32 %v3353_v35, %v4129_v10 }
 0x298   : > { %v3355_v59 = vpop.eup %3354  ;;  %3011 = vmatprep.mubr.msk.f32.mxu0 %vm731_vm0, %v1146_v28  ;;  %v3484_v28 = vld [vmem:[%s4943_s0 + $0x38] sm:$0xff] }
 0x299   : > { %v1088_v61 = vpop.xlane.xlu1 %1087  ;;  %3012 = vmatmul.mubr.msk.f32.gmra.mrb[34].mxu0 %vm731_vm0, %v1147_v1  ;;  %v1166_v48 = vmul.f32 %v3355_v59, %v4139_v14  ;;  %v3357_v42 = vpop.eup %3356  ;;  %v3485_v59 = vld [vmem:[%s4943_s0 + $0x30] sm:$0xff] }
 0x29a   : > { %3366 = vrcp.f32 %v1088_v61  ;;  %v1031_v47 = vpop.xlane.xlu0 %1030  ;;  %v1149_v14 = vmul.f32 %v3357_v42, %v4145_v0 }
 0x29b   : > { %3368 = vrcp.f32 %v1031_v47  ;;  %3047 = vmatprep.mubr.msk.f32.mxu1 %vm731_vm0, %v1166_v48 }
 0x29c   : > { %3048 = vmatmul.mubr.msk.f32.gmra.mrb[34].mxu1 %vm731_vm0, %v1167_v34 }
 0x29d   : > { %v3359_v40 = vpop.eup %3358  ;;  %v1091_v26 = vpop.xlane.xlu1 %1090 }
 0x29e   : > { %3370 = vrcp.f32 %v1091_v26  ;;  %v2347_v43 = vpop.xlane.xlu0 %2346  ;;  %v1148_v36 = vmul.f32 %v3359_v40, %v4153_v20  ;;  %v3361_v31 = vpop.eup %3360  ;;  %v3486_v26 = vld [vmem:[%s4943_s0 + $0x48] sm:$0xff] }
 0x29f   : > { %v2360_v18 = vmul.f32 0.0078125, %v2347_v43  ;;  %v1169_v20 = vmul.f32 %v3361_v31, %v4149_v25  ;;  %v3487_v31 = vld [vmem:[%s4943_s0 + $0x40] sm:$0xff] }
 0x2a0   : > { %v3363_v11 = vpop.eup %3362  ;;  %3014 = vmatprep.mubr.msk.f32.mxu0 %vm731_vm0, %v1148_v36 }
 0x2a1   : > { %v3365_v10 = vpop.eup %3364  ;;  %v4261_v51 = vsub.f32 %v4180_v9, %v2360_v18  ;;  %v2349_v17 = vpop.xlane.xlu1 %2348  ;;  %3015 = vmatmul.mubr.msk.f32.gmra.mrb[36].mxu0 %vm731_vm0, %v1149_v14  ;;  %v1168_v13 = vmul.f32 %v3363_v11, %v4157_v6 }
 0x2a2   : > { %v2361_v2 = vmul.f32 0.0078125, %v2349_v17  ;;  %v1150_v5 = vmul.f32 %v3365_v10, %v4161_v7 }
 0x2a3   : > { %3050 = vmatprep.mubr.msk.f32.mxu1 %vm731_vm0, %v1168_v13  ;;  %v2372_v0 = vmul.f32 %v4261_v51, %v4261_v51 }
 0x2a4   : > { %v3367_v38 = vpop.eup %3366  ;;  %v4271_v46 = vsub.f32 %v4184_v27, %v2361_v2  ;;  %3017 = vmatprep.mubr.msk.f32.mxu0 %vm731_vm0, %v1150_v5  ;;  %3051 = vmatmul.mubr.msk.f32.gmra.mrb[36].mxu1 %vm731_vm0, %v1169_v20  ;;  %v3488_v2 = vld [vmem:[%s4943_s0 + $0x58] sm:$0xff] }
 0x2a5   : > { %v3369_v9 = vpop.eup %3368  ;;  %2378 = vadd.xlane.f32.xlu0 %v2372_v0  ;;  %v1170_v6 = vmul.f32 %v3367_v38, %v4165_v21  ;;  %v3478_v21 = vld [vmem:[%s4943_s0 + $0x8] sm:$0xff]  ;;  %v3489_v0 = vld [vmem:[%s4943_s0 + $0x50] sm:$0xff] }
 0x2a6   : > { %v2373_v25 = vmul.f32 %v4271_v46, %v4271_v46  ;;  %v1151_v7 = vmul.f32 %v3369_v9, %v4169_v37  ;;  %v3479_v37 = vld [vmem:[%s4943_s0] sm:$0xff] }
 0x2a7   : > { %3053 = vmatprep.mubr.msk.f32.mxu1 %vm731_vm0, %v1170_v6 }
 0x2a8   : > { %v3371_v53 = vpop.eup %3370  ;;  %2380 = vadd.xlane.f32.xlu1 %v2373_v25  ;;  %3018 = vmatmul.mubr.msk.f32.gmra.mrb[38].mxu0 %vm731_vm0, %v1151_v7 }
 0x2a9   : > { %v1171_v27 = vmul.f32 %v3371_v53, %v4173_v22 }
 0x2ab   : > { %3054 = vmatmul.mubr.msk.f32.gmra.mrb[38].mxu1 %vm731_vm0, %v1171_v27  ;;  %v3490_v27 = vld [vmem:[%s4943_s0 + $0x68] sm:$0xff] }
 0x333   : > { %v2992_v57 = vpop.f32.mrb[20].mxu0 }
 0x334   : > { %v4286_v4 = vadd.f32 %v3478_v21, %v2992_v57  ;;  %v1302_v56 = vpop.f32.mrb[21].mxu0 }
 0x335   : > { %v4291_v39 = vadd.f32 %v3479_v37, %v1302_v56  ;;  %v3491_v56 = vld [vmem:[%s4943_s0 + $0x60] sm:$0xff] }
 0x336   : > { %1671 = vadd.xlane.f32.xlu1 %v4286_v4 }
 0x337   : > { %v3028_v58 = vpop.f32.mrb[20].mxu1  ;;  %1669 = vadd.xlane.f32.xlu0 %v4291_v39 }
 0x338   : > { %v4294_v22 = vadd.f32 %v3478_v21, %v3028_v58  ;;  %v1530_v32 = vpop.f32.mrb[21].mxu1 }
 0x339   : > { %v4297_v30 = vadd.f32 %v3479_v37, %v1530_v32 }
 0x33a   : > { %1711 = vadd.xlane.f32.xlu1 %v4294_v22 }
 0x33b   : > { %1709 = vadd.xlane.f32.xlu0 %v4297_v30 }
 0x33c   : > { %v2995_v12 = vpop.f32.mrb[22].mxu0 }
 0x33d   : > { %v4304_v16 = vadd.f32 %v3480_v23, %v2995_v12  ;;  %v1312_v55 = vpop.f32.mrb[23].mxu0 }
 0x33e   : > { %v4309_v33 = vadd.f32 %v3481_v44, %v1312_v55 }
 0x33f   : > { %v3031_v41 = vpop.f32.mrb[22].mxu1  ;;  %1675 = vadd.xlane.f32.xlu1 %v4304_v16 }
 0x340   : > { %v4312_v29 = vadd.f32 %v3480_v23, %v3031_v41  ;;  %v1540_v54 = vpop.f32.mrb[23].mxu1  ;;  %1673 = vadd.xlane.f32.xlu0 %v4309_v33 }
 0x341   : > { %v4315_v19 = vadd.f32 %v3481_v44, %v1540_v54  ;;  %v3492_v44 = vld [vmem:[%s4943_s0 + $0x78] sm:$0xff] }
 0x343   : > { %1715 = vadd.xlane.f32.xlu1 %v4312_v29 }
 0x344   : > { %v2998_v62 = vpop.f32.mrb[24].mxu0  ;;  %1713 = vadd.xlane.f32.xlu0 %v4315_v19 }
 0x345   : > { %v4322_v8 = vadd.f32 %v3482_v52, %v2998_v62  ;;  %v1322_v45 = vpop.f32.mrb[25].mxu0  ;;  %v3493_v62 = vld [vmem:[%s4943_s0 + $0x70] sm:$0xff] }
 0x346   : > { %v4327_v24 = vadd.f32 %v3483_v63, %v1322_v45 }
 0x347   : > { %v3034_v60 = vpop.f32.mrb[24].mxu1  ;;  %1679 = vadd.xlane.f32.xlu1 %v4322_v8 }
 0x348   : > { %v4330_v49 = vadd.f32 %v3482_v52, %v3034_v60  ;;  %v1550_v15 = vpop.f32.mrb[25].mxu1  ;;  %1677 = vadd.xlane.f32.xlu0 %v4327_v24 }
 0x349   : > { %v4333_v50 = vadd.f32 %v3483_v63, %v1550_v15 }
 0x34b   : > { %1719 = vadd.xlane.f32.xlu1 %v4330_v49 }
 0x34c   : > { %v3001_v3 = vpop.f32.mrb[26].mxu0  ;;  %1717 = vadd.xlane.f32.xlu0 %v4333_v50 }
 0x34d   : > { %v4340_v35 = vadd.f32 %v3484_v28, %v3001_v3  ;;  %v1332_v1 = vpop.f32.mrb[27].mxu0 }
 0x34e   : > { %v4345_v61 = vadd.f32 %v3485_v59, %v1332_v1 }
 0x34f   : > { %v3037_v48 = vpop.f32.mrb[26].mxu1  ;;  %1683 = vadd.xlane.f32.xlu1 %v4340_v35 }
 0x350   : > { %v4348_v47 = vadd.f32 %v3484_v28, %v3037_v48  ;;  %v1560_v34 = vpop.f32.mrb[27].mxu1  ;;  %1681 = vadd.xlane.f32.xlu0 %v4345_v61  ;;  %v3494_v28 = vld [vmem:[%s4943_s0 + $0x88] sm:$0xff]  ;;  %v3495_v48 = vld [vmem:[%s4943_s0 + $0x80] sm:$0xff] }
 0x351   : > { %v4351_v42 = vadd.f32 %v3485_v59, %v1560_v34 }
 0x353   : > { %1723 = vadd.xlane.f32.xlu1 %v4348_v47 }
 0x354   : > { %v3004_v40 = vpop.f32.mrb[28].mxu0  ;;  %1721 = vadd.xlane.f32.xlu0 %v4351_v42 }
 0x355   : > { %v4358_v43 = vadd.f32 %v3486_v26, %v3004_v40  ;;  %v1342_v36 = vpop.f32.mrb[29].mxu0 }
 0x356   : > { %v4363_v18 = vadd.f32 %v3487_v31, %v1342_v36 }
 0x357   : > { %v3040_v14 = vpop.f32.mrb[28].mxu1  ;;  %1687 = vadd.xlane.f32.xlu1 %v4358_v43 }
 0x358   : > { %v4366_v11 = vadd.f32 %v3486_v26, %v3040_v14  ;;  %v1570_v10 = vpop.f32.mrb[29].mxu1  ;;  %1685 = vadd.xlane.f32.xlu0 %v4363_v18 }
 0x359   : > { %v4369_v17 = vadd.f32 %v3487_v31, %v1570_v10  ;;  %v3496_v10 = vld [vmem:[%s4943_s0 + $0x98] sm:$0xff] }
 0x35b   : > { %1727 = vadd.xlane.f32.xlu1 %v4366_v11 }
 0x35c   : > { %v3007_v13 = vpop.f32.mrb[30].mxu0  ;;  %1725 = vadd.xlane.f32.xlu0 %v4369_v17 }
 0x35d   : > { %v4376_v5 = vadd.f32 %v3488_v2, %v3007_v13  ;;  %v1352_v20 = vpop.f32.mrb[31].mxu0 }
 0x35e   : > { %v4381_v38 = vadd.f32 %v3489_v0, %v1352_v20  ;;  %v3497_v20 = vld [vmem:[%s4943_s0 + $0x90] sm:$0xff] }
 0x35f   : > { %v3043_v9 = vpop.f32.mrb[30].mxu1  ;;  %1691 = vadd.xlane.f32.xlu1 %v4376_v5 }
 0x360   : > { %v4384_v6 = vadd.f32 %v3488_v2, %v3043_v9  ;;  %v1580_v25 = vpop.f32.mrb[31].mxu1  ;;  %1689 = vadd.xlane.f32.xlu0 %v4381_v38 }
 0x361   : > { %v4387_v7 = vadd.f32 %v3489_v0, %v1580_v25 }
 0x363   : > { %1731 = vadd.xlane.f32.xlu1 %v4384_v6 }
 0x364   : > { %v3010_v53 = vpop.f32.mrb[32].mxu0  ;;  %1729 = vadd.xlane.f32.xlu0 %v4387_v7 }
 0x365   : > { %v4394_v57 = vadd.f32 %v3490_v27, %v3010_v53  ;;  %v1362_v21 = vpop.f32.mrb[33].mxu0 }
 0x366   : > { %v4399_v37 = vadd.f32 %v3491_v56, %v1362_v21  ;;  %v4463_v21 = vpop.xlane.xlu1 %2355 }
 0x367   : > { %v3046_v58 = vpop.f32.mrb[32].mxu1  ;;  %1695 = vadd.xlane.f32.xlu1 %v4394_v57 }
 0x368   : > { %v4402_v32 = vadd.f32 %v3490_v27, %v3046_v58  ;;  %v1590_v12 = vpop.f32.mrb[33].mxu1  ;;  %1693 = vadd.xlane.f32.xlu0 %v4399_v37 }
 0x369   : > { %v4405_v23 = vadd.f32 %v3491_v56, %v1590_v12  ;;  %v4465_v56 = vpop.xlane.xlu0 %2353 }
 0x36a   : > { %v4467_v58 = vpop.xlane.xlu1 %2358 }
 0x36b   : > { %1735 = vadd.xlane.f32.xlu1 %v4402_v32 }
 0x36c   : > { %v3013_v55 = vpop.f32.mrb[34].mxu0  ;;  %1733 = vadd.xlane.f32.xlu0 %v4405_v23 }
 0x36d   : > { %v4412_v41 = vadd.f32 %v3492_v44, %v3013_v55  ;;  %v1372_v54 = vpop.f32.mrb[35].mxu0  ;;  %v4469_v12 = vpop.xlane.xlu0 %2351 }
 0x36e   : > { %v4417_v52 = vadd.f32 %v3493_v62, %v1372_v54  ;;  %v4471_v55 = vpop.xlane.xlu1 %2380 }
 0x36f   : > { %v3049_v45 = vpop.f32.mrb[34].mxu1  ;;  %1699 = vadd.xlane.f32.xlu1 %v4412_v41 }
 0x370   : > { %v4420_v63 = vadd.f32 %v3492_v44, %v3049_v45  ;;  %v1600_v60 = vpop.f32.mrb[35].mxu1  ;;  %1697 = vadd.xlane.f32.xlu0 %v4417_v52 }
 0x371   : > { %v4423_v15 = vadd.f32 %v3493_v62, %v1600_v60  ;;  %v4473_v44 = vpop.xlane.xlu0 %2378 }
 0x373   : > { %1739 = vadd.xlane.f32.xlu1 %v4420_v63 }
 0x374   : > { %v3016_v3 = vpop.f32.mrb[36].mxu0  ;;  %1737 = vadd.xlane.f32.xlu0 %v4423_v15 }
 0x375   : > { %v4430_v1 = vadd.f32 %v3494_v28, %v3016_v3  ;;  %v1382_v59 = vpop.f32.mrb[37].mxu0 }
 0x376   : > { %v4435_v34 = vadd.f32 %v3495_v48, %v1382_v59 }
 0x377   : > { %v3052_v40 = vpop.f32.mrb[36].mxu1  ;;  %1703 = vadd.xlane.f32.xlu1 %v4430_v1 }
 0x378   : > { %v4438_v26 = vadd.f32 %v3494_v28, %v3052_v40  ;;  %v1610_v36 = vpop.f32.mrb[37].mxu1  ;;  %1701 = vadd.xlane.f32.xlu0 %v4435_v34 }
 0x379   : > { %v4441_v31 = vadd.f32 %v3495_v48, %v1610_v36 }
 0x37b   : > { %1743 = vadd.xlane.f32.xlu1 %v4438_v26  ;;  %v3019_v14 = vpop.f32.mrb[38].mxu0 }
 0x37c   : > { %v4447_v13 = vadd.f32 %v3496_v10, %v3019_v14  ;;  %v1392_v2 = vpop.f32.mrb[39].mxu0  ;;  %1741 = vadd.xlane.f32.xlu0 %v4441_v31 }
 0x37d   : > { %v4453_v0 = vadd.f32 %v3497_v20, %v1392_v2 }
 0x37e   : > { %v3055_v9 = vpop.f32.mrb[38].mxu1 }
 0x37f   : > { %v1620_v25 = vpop.f32.mrb[39].mxu1  ;;  %1707 = vadd.xlane.f32.xlu1 %v4447_v13  ;;  %v4457_v53 = vadd.f32 %v3496_v10, %v3055_v9 }
 0x380   : > { %1705 = vadd.xlane.f32.xlu0 %v4453_v0  ;;  %v4459_v27 = vadd.f32 %v3497_v20, %v1620_v25 }
 0x383   : > { %1747 = vadd.xlane.f32.xlu1 %v4457_v53 }
 0x384   : > { %1745 = vadd.xlane.f32.xlu0 %v4459_v27 }
 0x3c3   : > { %v1672_v54 = vpop.xlane.xlu1 %1671 }
 0x3c4   : > { %v1751_v62 = vmul.f32 0.0078125, %v1672_v54  ;;  %v1670_v45 = vpop.xlane.xlu0 %1669 }
 0x3c5   : > { %v1750_v60 = vmul.f32 0.0078125, %v1670_v45 }
 0x3c6   : > { %v4476_v3 = vsub.f32 %v4286_v4, %v1751_v62 }
 0x3c7   : > { %v4479_v28 = vsub.f32 %v4291_v39, %v1750_v60  ;;  %v1712_v59 = vpop.xlane.xlu1 %1711 }
 0x3c8   : > { %v1771_v48 = vmul.f32 0.0078125, %v1712_v59  ;;  %v1710_v40 = vpop.xlane.xlu0 %1709  ;;  %v1831_v36 = vmul.f32 %v4476_v3, %v4476_v3 }
 0x3c9   : > { %v1770_v14 = vmul.f32 0.0078125, %v1710_v40  ;;  %v1830_v10 = vmul.f32 %v4479_v28, %v4479_v28 }
 0x3ca   : > { %v4486_v2 = vsub.f32 %v4294_v22, %v1771_v48  ;;  %1872 = vadd.xlane.f32.xlu1 %v1831_v36 }
 0x3cb   : > { %v4489_v4 = vsub.f32 %v4297_v30, %v1770_v14  ;;  %1870 = vadd.xlane.f32.xlu0 %v1830_v10 }
 0x3cc   : > { %v1676_v39 = vpop.xlane.xlu1 %1675  ;;  %v1851_v25 = vmul.f32 %v4486_v2, %v4486_v2 }
 0x3cd   : > { %v1753_v20 = vmul.f32 0.0078125, %v1676_v39  ;;  %v1674_v9 = vpop.xlane.xlu0 %1673  ;;  %v1850_v62 = vmul.f32 %v4489_v4, %v4489_v4 }
 0x3ce   : > { %v1752_v54 = vmul.f32 0.0078125, %v1674_v9  ;;  %1912 = vadd.xlane.f32.xlu1 %v1851_v25 }
 0x3cf   : > { %v4496_v45 = vsub.f32 %v4304_v16, %v1753_v20  ;;  %1910 = vadd.xlane.f32.xlu0 %v1850_v62 }
 0x3d0   : > { %v4499_v22 = vsub.f32 %v4309_v33, %v1752_v54  ;;  %v1716_v30 = vpop.xlane.xlu1 %1715 }
 0x3d1   : > { %v1773_v60 = vmul.f32 0.0078125, %v1716_v30  ;;  %v1714_v59 = vpop.xlane.xlu0 %1713  ;;  %v1833_v48 = vmul.f32 %v4496_v45, %v4496_v45 }
 0x3d2   : > { %v1772_v40 = vmul.f32 0.0078125, %v1714_v59  ;;  %v1832_v36 = vmul.f32 %v4499_v22, %v4499_v22 }
 0x3d3   : > { %v4506_v14 = vsub.f32 %v4312_v29, %v1773_v60  ;;  %1876 = vadd.xlane.f32.xlu1 %v1833_v48 }
 0x3d4   : > { %v4509_v16 = vsub.f32 %v4315_v19, %v1772_v40  ;;  %v1680_v33 = vpop.xlane.xlu1 %1679  ;;  %1874 = vadd.xlane.f32.xlu0 %v1832_v36 }
 0x3d5   : > { %v1755_v10 = vmul.f32 0.0078125, %v1680_v33  ;;  %v1678_v39 = vpop.xlane.xlu0 %1677  ;;  %v1853_v20 = vmul.f32 %v4506_v14, %v4506_v14 }
 0x3d6   : > { %v1754_v9 = vmul.f32 0.0078125, %v1678_v39  ;;  %v1852_v25 = vmul.f32 %v4509_v16, %v4509_v16 }
 0x3d7   : > { %v4516_v54 = vsub.f32 %v4322_v8, %v1755_v10  ;;  %1916 = vadd.xlane.f32.xlu1 %v1853_v20 }
 0x3d8   : > { %v4519_v29 = vsub.f32 %v4327_v24, %v1754_v9  ;;  %v1720_v19 = vpop.xlane.xlu1 %1719  ;;  %1914 = vadd.xlane.f32.xlu0 %v1852_v25 }
 0x3d9   : > { %v1775_v62 = vmul.f32 0.0078125, %v1720_v19  ;;  %v1718_v30 = vpop.xlane.xlu0 %1717  ;;  %v1835_v60 = vmul.f32 %v4516_v54, %v4516_v54 }
 0x3da   : > { %v1774_v59 = vmul.f32 0.0078125, %v1718_v30  ;;  %v1834_v48 = vmul.f32 %v4519_v29, %v4519_v29 }
 0x3db   : > { %v4526_v40 = vsub.f32 %v4330_v49, %v1775_v62  ;;  %1880 = vadd.xlane.f32.xlu1 %v1835_v60 }
 0x3dc   : > { %v4529_v8 = vsub.f32 %v4333_v50, %v1774_v59  ;;  %v1684_v24 = vpop.xlane.xlu1 %1683  ;;  %1878 = vadd.xlane.f32.xlu0 %v1834_v48 }
 0x3dd   : > { %v1757_v36 = vmul.f32 0.0078125, %v1684_v24  ;;  %v1682_v33 = vpop.xlane.xlu0 %1681  ;;  %v1855_v10 = vmul.f32 %v4526_v40, %v4526_v40 }
 0x3de   : > { %v1756_v39 = vmul.f32 0.0078125, %v1682_v33  ;;  %v1854_v20 = vmul.f32 %v4529_v8, %v4529_v8 }
 0x3df   : > { %v4536_v9 = vsub.f32 %v4340_v35, %v1757_v36  ;;  %1920 = vadd.xlane.f32.xlu1 %v1855_v10 }
 0x3e0   : > { %v4539_v49 = vsub.f32 %v4345_v61, %v1756_v39  ;;  %v1724_v50 = vpop.xlane.xlu1 %1723  ;;  %1918 = vadd.xlane.f32.xlu0 %v1854_v20 }
 0x3e1   : > { %v1777_v25 = vmul.f32 0.0078125, %v1724_v50  ;;  %v1722_v19 = vpop.xlane.xlu0 %1721  ;;  %v1837_v62 = vmul.f32 %v4536_v9, %v4536_v9 }
 0x3e2   : > { %v1776_v30 = vmul.f32 0.0078125, %v1722_v19  ;;  %v1836_v60 = vmul.f32 %v4539_v49, %v4539_v49 }
 0x3e3   : > { %v4546_v59 = vsub.f32 %v4348_v47, %v1777_v25  ;;  %1884 = vadd.xlane.f32.xlu1 %v1837_v62 }
 0x3e4   : > { %v4549_v35 = vsub.f32 %v4351_v42, %v1776_v30  ;;  %v1688_v61 = vpop.xlane.xlu1 %1687  ;;  %1882 = vadd.xlane.f32.xlu0 %v1836_v60 }
 0x3e5   : > { %v1759_v48 = vmul.f32 0.0078125, %v1688_v61  ;;  %v1686_v24 = vpop.xlane.xlu0 %1685  ;;  %v1857_v36 = vmul.f32 %v4546_v59, %v4546_v59 }
 0x3e6   : > { %v1758_v33 = vmul.f32 0.0078125, %v1686_v24  ;;  %v1856_v10 = vmul.f32 %v4549_v35, %v4549_v35 }
 0x3e7   : > { %v4556_v39 = vsub.f32 %v4358_v43, %v1759_v48  ;;  %1924 = vadd.xlane.f32.xlu1 %v1857_v36 }
 0x3e8   : > { %v4559_v47 = vsub.f32 %v4363_v18, %v1758_v33  ;;  %v1728_v42 = vpop.xlane.xlu1 %1727  ;;  %1922 = vadd.xlane.f32.xlu0 %v1856_v10  ;;  %v4954_v10 = vmov 0.0|0.0  }
 0x3e9   : > { %v1779_v20 = vmul.f32 0.0078125, %v1728_v42  ;;  %v1726_v50 = vpop.xlane.xlu0 %1725  ;;  %v1839_v25 = vmul.f32 %v4556_v39, %v4556_v39  ;;  %3090 = vmatprep.subr.bf16.mxu0 %v4954_v10  ;;  %3120 = vmatprep.subr.bf16.mxu1 %v4954_v10 }
 0x3ea   : > { %v1778_v19 = vmul.f32 0.0078125, %v1726_v50  ;;  %v1838_v62 = vmul.f32 %v4559_v47, %v4559_v47 }
 0x3eb   : > { %v4566_v30 = vsub.f32 %v4366_v11, %v1779_v20  ;;  %1888 = vadd.xlane.f32.xlu1 %v1839_v25 }
 0x3ec   : > { %v4569_v43 = vsub.f32 %v4369_v17, %v1778_v19  ;;  %v1692_v18 = vpop.xlane.xlu1 %1691  ;;  %1886 = vadd.xlane.f32.xlu0 %v1838_v62 }
 0x3ed   : > { %v1761_v60 = vmul.f32 0.0078125, %v1692_v18  ;;  %v1690_v61 = vpop.xlane.xlu0 %1689  ;;  %v1859_v48 = vmul.f32 %v4566_v30, %v4566_v30 }
 0x3ee   : > { %v1760_v24 = vmul.f32 0.0078125, %v1690_v61  ;;  %v1858_v36 = vmul.f32 %v4569_v43, %v4569_v43 }
 0x3ef   : > { %v4576_v33 = vsub.f32 %v4376_v5, %v1761_v60  ;;  %1928 = vadd.xlane.f32.xlu1 %v1859_v48 }
 0x3f0   : > { %v4579_v11 = vsub.f32 %v4381_v38, %v1760_v24  ;;  %v1732_v17 = vpop.xlane.xlu1 %1731  ;;  %1926 = vadd.xlane.f32.xlu0 %v1858_v36 }
 0x3f1   : > { %v1781_v42 = vmul.f32 0.0078125, %v1732_v17  ;;  %v1730_v20 = vpop.xlane.xlu0 %1729  ;;  %v1841_v50 = vmul.f32 %v4576_v33, %v4576_v33 }
 0x3f2   : > { %v1780_v25 = vmul.f32 0.0078125, %v1730_v20  ;;  %v1840_v5 = vmul.f32 %v4579_v11, %v4579_v11 }
 0x3f3   : > { %v4588_v19 = vsub.f32 %v4384_v6, %v1781_v42  ;;  %1892 = vadd.xlane.f32.xlu1 %v1841_v50 }
 0x3f4   : > { %v4591_v38 = vsub.f32 %v4387_v7, %v1780_v25  ;;  %v1696_v62 = vpop.xlane.xlu1 %1695  ;;  %1890 = vadd.xlane.f32.xlu0 %v1840_v5 }
 0x3f5   : > { %v1763_v18 = vmul.f32 0.0078125, %v1696_v62  ;;  %v1694_v60 = vpop.xlane.xlu0 %1693  ;;  %v1861_v61 = vmul.f32 %v4588_v19, %v4588_v19 }
 0x3f6   : > { %v1762_v48 = vmul.f32 0.0078125, %v1694_v60  ;;  %v1860_v24 = vmul.f32 %v4591_v38, %v4591_v38 }
 0x3f7   : > { %v4598_v36 = vsub.f32 %v4394_v57, %v1763_v18  ;;  %1932 = vadd.xlane.f32.xlu1 %v1861_v61 }
 0x3f8   : > { %v4601_v6 = vsub.f32 %v4399_v37, %v1762_v48  ;;  %v1736_v7 = vpop.xlane.xlu1 %1735  ;;  %1930 = vadd.xlane.f32.xlu0 %v1860_v24 }
 0x3f9   : > { %v1783_v17 = vmul.f32 0.0078125, %v1736_v7  ;;  %v1734_v42 = vpop.xlane.xlu0 %1733  ;;  %v1843_v20 = vmul.f32 %v4598_v36, %v4598_v36 }
 0x3fa   : > { %v1782_v50 = vmul.f32 0.0078125, %v1734_v42  ;;  %v1842_v25 = vmul.f32 %v4601_v6, %v4601_v6 }
 0x3fb   : > { %v4608_v5 = vsub.f32 %v4402_v32, %v1783_v17  ;;  %1896 = vadd.xlane.f32.xlu1 %v1843_v20 }
 0x3fc   : > { %v4611_v57 = vsub.f32 %v4405_v23, %v1782_v50  ;;  %v1700_v37 = vpop.xlane.xlu1 %1699  ;;  %1894 = vadd.xlane.f32.xlu0 %v1842_v25 }
 0x3fd   : > { %v1765_v62 = vmul.f32 0.0078125, %v1700_v37  ;;  %v1698_v18 = vpop.xlane.xlu0 %1697  ;;  %v1863_v60 = vmul.f32 %v4608_v5, %v4608_v5 }
 0x3fe   : > { %v1764_v61 = vmul.f32 0.0078125, %v1698_v18  ;;  %v1862_v48 = vmul.f32 %v4611_v57, %v4611_v57 }
 0x3ff   : > { %v4618_v24 = vsub.f32 %v4412_v41, %v1765_v62  ;;  %1936 = vadd.xlane.f32.xlu1 %v1863_v60 }
 0x400   : > { %v4621_v32 = vsub.f32 %v4417_v52, %v1764_v61  ;;  %v1740_v23 = vpop.xlane.xlu1 %1739  ;;  %1934 = vadd.xlane.f32.xlu0 %v1862_v48 }
 0x401   : > { %v1785_v7 = vmul.f32 0.0078125, %v1740_v23  ;;  %v1738_v17 = vpop.xlane.xlu0 %1737  ;;  %v1845_v42 = vmul.f32 %v4618_v24, %v4618_v24 }
 0x402   : > { %v1784_v20 = vmul.f32 0.0078125, %v1738_v17  ;;  %v1844_v50 = vmul.f32 %v4621_v32, %v4621_v32 }
 0x403   : > { %v4628_v25 = vsub.f32 %v4420_v63, %v1785_v7  ;;  %1900 = vadd.xlane.f32.xlu1 %v1845_v42 }
 0x404   : > { %v4631_v41 = vsub.f32 %v4423_v15, %v1784_v20  ;;  %v1704_v52 = vpop.xlane.xlu1 %1703  ;;  %1898 = vadd.xlane.f32.xlu0 %v1844_v50 }
 0x405   : > { %v1767_v37 = vmul.f32 0.0078125, %v1704_v52  ;;  %v1702_v62 = vpop.xlane.xlu0 %1701  ;;  %v1865_v18 = vmul.f32 %v4628_v25, %v4628_v25 }
 0x406   : > { %v1766_v60 = vmul.f32 0.0078125, %v1702_v62  ;;  %v1864_v61 = vmul.f32 %v4631_v41, %v4631_v41 }
 0x407   : > { %v4638_v48 = vsub.f32 %v4430_v1, %v1767_v37  ;;  %1940 = vadd.xlane.f32.xlu1 %v1865_v18 }
 0x408   : > { %v4641_v63 = vsub.f32 %v4435_v34, %v1766_v60  ;;  %v1744_v15 = vpop.xlane.xlu1 %1743  ;;  %1938 = vadd.xlane.f32.xlu0 %v1864_v61 }
 0x409   : > { %v1787_v23 = vmul.f32 0.0078125, %v1744_v15  ;;  %v1742_v7 = vpop.xlane.xlu0 %1741  ;;  %v1847_v17 = vmul.f32 %v4638_v48, %v4638_v48  ;;  %v2364_v15 = vmul.f32 0.0078125, %v4463_v21 }
 0x40a   : > { %v1786_v42 = vmul.f32 0.0078125, %v1742_v7  ;;  %v1846_v20 = vmul.f32 %v4641_v63, %v4641_v63 }
 0x40b   : > { %v4648_v50 = vsub.f32 %v4438_v26, %v1787_v23  ;;  %1904 = vadd.xlane.f32.xlu1 %v1847_v17 }
 0x40c   : > { %v4651_v1 = vsub.f32 %v4441_v31, %v1786_v42  ;;  %v1708_v34 = vpop.xlane.xlu1 %1707  ;;  %1902 = vadd.xlane.f32.xlu0 %v1846_v20  ;;  %v2363_v42 = vmul.f32 0.0078125, %v4465_v56 }
 0x40d   : > { %v1769_v52 = vmul.f32 0.0078125, %v1708_v34  ;;  %v1706_v37 = vpop.xlane.xlu0 %1705  ;;  %v1867_v62 = vmul.f32 %v4648_v50, %v4648_v50  ;;  %v2362_v34 = vmul.f32 0.0078125, %v4469_v12  ;;  %v3501_v12 = vld [vmem:[%s3735_s15 + $0x10] sm:$0x1] }
 0x40e   : > { %v1768_v18 = vmul.f32 0.0078125, %v1706_v37  ;;  %v1866_v60 = vmul.f32 %v4651_v1, %v4651_v1  ;;  %v3498_v37 = vld [vmem:[%s3735_s15 + $0x20] sm:$0xff] }
 0x40f   : > { %v4658_v61 = vsub.f32 %v4447_v13, %v1769_v52  ;;  %1944 = vadd.xlane.f32.xlu1 %v1867_v62  ;;  %v2365_v13 = vmul.f32 0.0078125, %v4467_v58  ;;  %v4678_v62 = vsub.f32 %v3498_v37, %v2364_v15  ;;  %v3499_v58 = vld [vmem:[%s3735_s15 + $0x18] sm:$0xff] }
 0x410   : > { %v4661_v26 = vsub.f32 %v4453_v0, %v1768_v18  ;;  %v1748_v31 = vpop.xlane.xlu1 %1747  ;;  %1942 = vadd.xlane.f32.xlu0 %v1866_v60  ;;  %v4683_v18 = vsub.f32 %v3499_v58, %v2363_v42  ;;  %v3500_v60 = vld [vmem:[%s3735_s15 + $0x28] sm:$0x1]  ;;  %s2811_s15 = sshll.u32 %s3666_s28, 5  ;;  %s4901_s28 = scalar_lea.sflag [#allocation4], %s300_s29 }
 0x411   : > { %v1789_v23 = vmul.f32 0.0078125, %v1748_v31  ;;  %v1746_v7 = vpop.xlane.xlu0 %1745  ;;  %v1849_v17 = vmul.f32 %v4658_v61, %v4658_v61  ;;  %4967 = vst [vmem:[#allocation8_spill] sm:$0xff] %v4678_v62  ;;  %v4686_v31 = vsub.f32 %v3500_v60, %v2365_v13  ;;  %s4897_s18 = scalar_lea.hbm %s4949_s6, %s2811_s15 }
 0x412   : > { %v1788_v20 = vmul.f32 0.0078125, %v1746_v7  ;;  %v1848_v0 = vmul.f32 %v4661_v26, %v4661_v26  ;;  %4968 = vst [vmem:[#allocation9_spill] sm:$0xff] %v4683_v18  ;;  %v2375_v15 = vmul.f32 %v4683_v18, %v4683_v18 }
 0x413   : > { %v4672_v21 = vsub.f32 %v4457_v53, %v1789_v23  ;;  %1908 = vadd.xlane.f32.xlu1 %v1849_v17  ;;  %4969 = vst [vmem:[#allocation10_spill] sm:$0xff] %v4686_v31  ;;  %v4691_v23 = vsub.f32 %v3501_v12, %v2362_v34  ;;  %v2377_v7 = vmul.f32 %v4686_v31, %v4686_v31 }
 0x414   : > { %v4675_v52 = vsub.f32 %v4459_v27, %v1788_v20  ;;  %1906 = vadd.xlane.f32.xlu0 %v1848_v0  ;;  %v2376_v27 = vmul.f32 %v4678_v62, %v4678_v62  ;;  %v356_v20 = vld [vmem:[#allocation2 + $0x8] sm:$0x1f] }
 0x415   : > { %v1869_v56 = vmul.f32 %v4672_v21, %v4672_v21  ;;  %4970 = vst [vmem:[#allocation11_spill] sm:$0xff] %v4691_v23  ;;  %v2374_v17 = vmul.f32 %v4691_v23, %v4691_v23  ;;  %v2389_v42 = vsel %vm1232_vm1, %v2377_v7, 0.0  ;;  %2800 = vmatprep.mubr.msk.f32.mxu0 %vm2202_vm2, %v356_v20  ;;  %2801 = vmatprep.mubr.msk.f32.mxu1 %vm2202_vm2, %v356_v20 }
 0x416   : > { %v1868_v53 = vmul.f32 %v4675_v52, %v4675_v52 }
 0x417   : > { %1948 = vadd.xlane.f32.xlu1 %v1869_v56  ;;  %v2382_v13 = vsel %vm1232_vm1, %v2374_v17, 0.0 }
 0x418   : > { %1946 = vadd.xlane.f32.xlu0 %v1868_v53 }
 0x41b   : > { %2387 = vadd.xlane.f32.xlu1 %v2376_v27 }
 0x41c   : > { %2385 = vadd.xlane.f32.xlu0 %v2375_v15 }
 0x41f   : > { %2390 = vadd.xlane.f32.xlu1 %v2389_v42 }
 0x420   : > { %2383 = vadd.xlane.f32.xlu0 %v2382_v13 }
 0x457   : > { %v1873_v0 = vpop.xlane.xlu1 %1872 }
 0x458   : > { %v1951_v34 = vmul.f32 0.0078125, %v1873_v0  ;;  %v1871_v37 = vpop.xlane.xlu0 %1870 }
 0x459   : > { %v1950_v56 = vmul.f32 0.0078125, %v1871_v37 }
 0x45a   : > { %v1991_v58 = vadd.f32 1e-05, %v1951_v34 }
 0x45b   : > { %v1990_v60 = vadd.f32 1e-05, %v1950_v56  ;;  %v1913_v53 = vpop.xlane.xlu1 %1912 }
 0x45c   : > { %3372 = vrsqrt.f32 %v1991_v58  ;;  %v1971_v12 = vmul.f32 0.0078125, %v1913_v53  ;;  %v1911_v27 = vpop.xlane.xlu0 %1910 }
 0x45d   : > { %3374 = vrsqrt.f32 %v1990_v60  ;;  %v1970_v15 = vmul.f32 0.0078125, %v1911_v27 }
 0x45e   : > { %v2011_v7 = vadd.f32 1e-05, %v1971_v12 }
 0x45f   : > { %v2010_v42 = vadd.f32 1e-05, %v1970_v15 }
 0x460   : > { %v1877_v17 = vpop.xlane.xlu1 %1876  ;;  %3376 = vrsqrt.f32 %v2011_v7 }
 0x461   : > { %v1953_v13 = vmul.f32 0.0078125, %v1877_v17  ;;  %v1875_v10 = vpop.xlane.xlu0 %1874  ;;  %3378 = vrsqrt.f32 %v2010_v42 }
 0x462   : > { %v1952_v20 = vmul.f32 0.0078125, %v1875_v10 }
 0x463   : > { %v1993_v23 = vadd.f32 1e-05, %v1953_v13 }
 0x464   : > { %v1992_v0 = vadd.f32 1e-05, %v1952_v20  ;;  %v1917_v31 = vpop.xlane.xlu1 %1916 }
 0x465   : > { %3380 = vrsqrt.f32 %v1993_v23  ;;  %v1973_v34 = vmul.f32 0.0078125, %v1917_v31  ;;  %v1915_v37 = vpop.xlane.xlu0 %1914  ;;  %v4708_v23 = vld [vmem:[%s4947_s4] ss:$0 sm:$0xff] }
 0x466   : > { %3382 = vrsqrt.f32 %v1992_v0  ;;  %v1972_v56 = vmul.f32 0.0078125, %v1915_v37  ;;  %v3373_v58 = vpop.eup %3372 }
 0x467   : > { %v2013_v53 = vadd.f32 1e-05, %v1973_v34  ;;  %v3375_v60 = vpop.eup %3374  ;;  %v2071_v12 = vmul.f32 %v3373_v58, %v4476_v3  ;;  %v4714_v3 = vld [vmem:[%s4948_s5] ss:$0 sm:$0xff] }
 0x468   : > { %v2012_v27 = vadd.f32 1e-05, %v1972_v56  ;;  %v1881_v15 = vpop.xlane.xlu1 %1880  ;;  %v2070_v7 = vmul.f32 %v3375_v60, %v4479_v28 }
 0x469   : > { %3384 = vrsqrt.f32 %v2013_v53  ;;  %v1955_v42 = vmul.f32 0.0078125, %v1881_v15  ;;  %v1879_v10 = vpop.xlane.xlu0 %1878  ;;  %v2117_v17 = vmul.f32 %v4708_v23, %v2071_v12 }
 0x46a   : > { %3386 = vrsqrt.f32 %v2012_v27  ;;  %v1954_v31 = vmul.f32 0.0078125, %v1879_v10  ;;  %v3377_v13 = vpop.eup %3376  ;;  %v2116_v28 = vmul.f32 %v4708_v23, %v2070_v7 }
 0x46b   : > { %v1995_v20 = vadd.f32 1e-05, %v1955_v42  ;;  %v3379_v0 = vpop.eup %3378  ;;  %v2091_v34 = vmul.f32 %v3377_v13, %v4486_v2  ;;  %v2163_v58 = vadd.f32 %v4714_v3, %v2117_v17 }
 0x46c   : > { %v1994_v37 = vadd.f32 1e-05, %v1954_v31  ;;  %v1921_v56 = vpop.xlane.xlu1 %1920  ;;  %v2090_v53 = vmul.f32 %v3379_v0, %v4489_v4  ;;  %v2162_v27 = vadd.f32 %v4714_v3, %v2116_v28 }
 0x46d   : > { %3388 = vrsqrt.f32 %v1995_v20  ;;  %v1975_v60 = vmul.f32 0.0078125, %v1921_v56  ;;  %v1919_v12 = vpop.xlane.xlu0 %1918  ;;  %v2137_v42 = vmul.f32 %v4708_v23, %v2091_v34  ;;  %v4971_v56 = vmov 0.0|0.0  }
 0x46e   : > { %3390 = vrsqrt.f32 %v1994_v37  ;;  %v1974_v15 = vmul.f32 0.0078125, %v1919_v12  ;;  %v3091_v18 = vpack.c.bf16 %v2163_v58, %v2162_v27  ;;  %v2136_v2 = vmul.f32 %v4708_v23, %v2090_v53 }
 0x46f   : > { %v3381_v10 = vpop.eup %3380  ;;  %v2015_v7 = vadd.f32 1e-05, %v1975_v60  ;;  %v2183_v4 = vadd.f32 %v4714_v3, %v2137_v42 }
 0x470   : > { %v3383_v31 = vpop.eup %3382  ;;  %v2073_v13 = vmul.f32 %v3381_v10, %v4496_v45  ;;  %v2014_v17 = vadd.f32 1e-05, %v1974_v15  ;;  %v1885_v62 = vpop.xlane.xlu1 %1884  ;;  %3092 = vmatpush1.bf16.msra.mxu0 %v3091_v18  ;;  %v2182_v34 = vadd.f32 %v4714_v3, %v2136_v2 }
 0x471   : > { %v2072_v20 = vmul.f32 %v3383_v31, %v4499_v22  ;;  %3392 = vrsqrt.f32 %v2015_v7  ;;  %v1957_v28 = vmul.f32 0.0078125, %v1885_v62  ;;  %v1883_v0 = vpop.xlane.xlu0 %1882  ;;  %3093 = vmatprep.subr.bf16.mxu0 %v4971_v56 }
 0x472   : > { %3394 = vrsqrt.f32 %v2014_v17  ;;  %v1956_v37 = vmul.f32 0.0078125, %v1883_v0  ;;  %v2119_v58 = vmul.f32 %v4708_v23, %v2073_v13  ;;  %v3121_v60 = vpack.c.bf16 %v2183_v4, %v2182_v34 }
 0x473   : > { %v3385_v53 = vpop.eup %3384  ;;  %v1997_v45 = vadd.f32 1e-05, %v1957_v28  ;;  %v2118_v12 = vmul.f32 %v4708_v23, %v2072_v20 }
 0x474   : > { %v3387_v27 = vpop.eup %3386  ;;  %v2093_v22 = vmul.f32 %v3385_v53, %v4506_v14  ;;  %v1996_v15 = vadd.f32 1e-05, %v1956_v37  ;;  %v1925_v62 = vpop.xlane.xlu1 %1924  ;;  %v2165_v18 = vadd.f32 %v4714_v3, %v2119_v58  ;;  %3122 = vmatpush1.bf16.msra.mxu1 %v3121_v60 }
 0x475   : > { %v2092_v42 = vmul.f32 %v3387_v27, %v4509_v16  ;;  %3396 = vrsqrt.f32 %v1997_v45  ;;  %v1977_v10 = vmul.f32 0.0078125, %v1925_v62  ;;  %v1923_v7 = vpop.xlane.xlu0 %1922  ;;  %v2164_v2 = vadd.f32 %v4714_v3, %v2118_v12  ;;  %3123 = vmatprep.subr.bf16.mxu1 %v4971_v56 }
 0x476   : > { %3398 = vrsqrt.f32 %v1996_v15  ;;  %v1976_v31 = vmul.f32 0.0078125, %v1923_v7  ;;  %v2139_v13 = vmul.f32 %v4708_v23, %v2093_v22 }
 0x477   : > { %v3389_v17 = vpop.eup %3388  ;;  %v2017_v14 = vadd.f32 1e-05, %v1977_v10  ;;  %v3094_v4 = vpack.c.bf16 %v2165_v18, %v2164_v2  ;;  %v2138_v20 = vmul.f32 %v4708_v23, %v2092_v42 }
 0x478   : > { %v3391_v28 = vpop.eup %3390  ;;  %v2075_v16 = vmul.f32 %v3389_v17, %v4516_v54  ;;  %v2016_v0 = vadd.f32 1e-05, %v1976_v31  ;;  %v1889_v34 = vpop.xlane.xlu1 %1888  ;;  %v2185_v37 = vadd.f32 %v4714_v3, %v2139_v13 }
 0x479   : > { %v2074_v58 = vmul.f32 %v3391_v28, %v4519_v29  ;;  %3400 = vrsqrt.f32 %v2017_v14  ;;  %v1959_v53 = vmul.f32 0.0078125, %v1889_v34  ;;  %3095 = vmatpush1.bf16.msra.mxu0 %v3094_v4  ;;  %v1887_v45 = vpop.xlane.xlu0 %1886  ;;  %v2184_v60 = vadd.f32 %v4714_v3, %v2138_v20 }
 0x47a   : > { %3402 = vrsqrt.f32 %v2016_v0  ;;  %v1958_v12 = vmul.f32 0.0078125, %v1887_v45  ;;  %3096 = vmatprep.subr.bf16.mxu0 %v4971_v56  ;;  %v2121_v27 = vmul.f32 %v4708_v23, %v2075_v16 }
 0x47b   : > { %v3393_v22 = vpop.eup %3392  ;;  %v1999_v54 = vadd.f32 1e-05, %v1959_v53  ;;  %v3124_v15 = vpack.c.bf16 %v2185_v37, %v2184_v60  ;;  %v2120_v62 = vmul.f32 %v4708_v23, %v2074_v58 }
 0x47c   : > { %v3395_v18 = vpop.eup %3394  ;;  %v2095_v29 = vmul.f32 %v3393_v22, %v4526_v40  ;;  %v1998_v42 = vadd.f32 1e-05, %v1958_v12  ;;  %v1929_v10 = vpop.xlane.xlu1 %1928  ;;  %v2167_v7 = vadd.f32 %v4714_v3, %v2121_v27 }
 0x47d   : > { %v2094_v2 = vmul.f32 %v3395_v18, %v4529_v8  ;;  %3404 = vrsqrt.f32 %v1999_v54  ;;  %v1979_v31 = vmul.f32 0.0078125, %v1929_v10  ;;  %3125 = vmatpush1.bf16.msra.mxu1 %v3124_v15  ;;  %v1927_v13 = vpop.xlane.xlu0 %1926  ;;  %v2166_v17 = vadd.f32 %v4714_v3, %v2120_v62 }
 0x47e   : > { %3406 = vrsqrt.f32 %v1998_v42  ;;  %v1978_v14 = vmul.f32 0.0078125, %v1927_v13  ;;  %3126 = vmatprep.subr.bf16.mxu1 %v4971_v56  ;;  %v2141_v4 = vmul.f32 %v4708_v23, %v2095_v29 }
 0x47f   : > { %v3397_v20 = vpop.eup %3396  ;;  %v2019_v40 = vadd.f32 1e-05, %v1979_v31  ;;  %v3097_v28 = vpack.c.bf16 %v2167_v7, %v2166_v17  ;;  %v2140_v16 = vmul.f32 %v4708_v23, %v2094_v2 }
 0x480   : > { %v3399_v0 = vpop.eup %3398  ;;  %v2077_v8 = vmul.f32 %v3397_v20, %v4536_v9  ;;  %v2018_v34 = vadd.f32 1e-05, %v1978_v14  ;;  %v1893_v37 = vpop.xlane.xlu1 %1892  ;;  %v2187_v58 = vadd.f32 %v4714_v3, %v2141_v4 }
 0x481   : > { %v2076_v53 = vmul.f32 %v3399_v0, %v4539_v49  ;;  %3408 = vrsqrt.f32 %v2019_v40  ;;  %v1961_v45 = vmul.f32 0.0078125, %v1893_v37  ;;  %3098 = vmatpush1.bf16.msra.mxu0 %v3097_v28  ;;  %v1891_v60 = vpop.xlane.xlu0 %1890  ;;  %v2186_v12 = vadd.f32 %v4714_v3, %v2140_v16 }
 0x482   : > { %3410 = vrsqrt.f32 %v2018_v34  ;;  %v1960_v27 = vmul.f32 0.0078125, %v1891_v60  ;;  %3099 = vmatprep.subr.bf16.mxu0 %v4971_v56  ;;  %v2123_v22 = vmul.f32 %v4708_v23, %v2077_v8 }
 0x483   : > { %v3401_v54 = vpop.eup %3400  ;;  %v2001_v9 = vadd.f32 1e-05, %v1961_v45  ;;  %v3127_v15 = vpack.c.bf16 %v2187_v58, %v2186_v12  ;;  %v2122_v62 = vmul.f32 %v4708_v23, %v2076_v53 }
 0x484   : > { %v3403_v18 = vpop.eup %3402  ;;  %v2097_v49 = vmul.f32 %v3401_v54, %v4546_v59  ;;  %v2000_v29 = vadd.f32 1e-05, %v1960_v27  ;;  %v1933_v42 = vpop.xlane.xlu1 %1932  ;;  %v2169_v10 = vadd.f32 %v4714_v3, %v2123_v22 }
 0x485   : > { %v2096_v7 = vmul.f32 %v3403_v18, %v4549_v35  ;;  %3412 = vrsqrt.f32 %v2001_v9  ;;  %v1981_v2 = vmul.f32 0.0078125, %v1933_v42  ;;  %3128 = vmatpush1.bf16.msra.mxu1 %v3127_v15  ;;  %v1931_v31 = vpop.xlane.xlu0 %1930  ;;  %v2168_v13 = vadd.f32 %v4714_v3, %v2122_v62 }
 0x486   : > { %3414 = vrsqrt.f32 %v2000_v29  ;;  %v1980_v17 = vmul.f32 0.0078125, %v1931_v31  ;;  %3129 = vmatprep.subr.bf16.mxu1 %v4971_v56  ;;  %v2143_v14 = vmul.f32 %v4708_v23, %v2097_v49 }
 0x487   : > { %v3405_v4 = vpop.eup %3404  ;;  %v2021_v59 = vadd.f32 1e-05, %v1981_v2  ;;  %v3100_v20 = vpack.c.bf16 %v2169_v10, %v2168_v13  ;;  %v2142_v40 = vmul.f32 %v4708_v23, %v2096_v7 }
 0x488   : > { %v3407_v28 = vpop.eup %3406  ;;  %v2079_v35 = vmul.f32 %v3405_v4, %v4556_v39  ;;  %v2020_v16 = vadd.f32 1e-05, %v1980_v17  ;;  %v1897_v0 = vpop.xlane.xlu1 %1896  ;;  %v2189_v8 = vadd.f32 %v4714_v3, %v2143_v14 }
 0x489   : > { %v2078_v34 = vmul.f32 %v3407_v28, %v4559_v47  ;;  %3416 = vrsqrt.f32 %v2021_v59  ;;  %v1963_v37 = vmul.f32 0.0078125, %v1897_v0  ;;  %3101 = vmatpush1.bf16.msra.mxu0 %v3100_v20  ;;  %v1895_v58 = vpop.xlane.xlu0 %1894  ;;  %v2188_v53 = vadd.f32 %v4714_v3, %v2142_v40 }
 0x48a   : > { %3418 = vrsqrt.f32 %v2020_v16  ;;  %v1962_v45 = vmul.f32 0.0078125, %v1895_v58  ;;  %3102 = vmatprep.subr.bf16.mxu0 %v4971_v56  ;;  %v2125_v60 = vmul.f32 %v4708_v23, %v2079_v35 }
 0x48b   : > { %v3409_v12 = vpop.eup %3408  ;;  %v2003_v39 = vadd.f32 1e-05, %v1963_v37  ;;  %v3130_v27 = vpack.c.bf16 %v2189_v8, %v2188_v53  ;;  %v2124_v22 = vmul.f32 %v4708_v23, %v2078_v34 }
 0x48c   : > { %v3411_v54 = vpop.eup %3410  ;;  %v2099_v47 = vmul.f32 %v3409_v12, %v4566_v30  ;;  %v2002_v9 = vadd.f32 1e-05, %v1962_v45  ;;  %v1937_v15 = vpop.xlane.xlu1 %1936  ;;  %v2171_v62 = vadd.f32 %v4714_v3, %v2125_v60 }
 0x48d   : > { %v2098_v18 = vmul.f32 %v3411_v54, %v4569_v43  ;;  %3420 = vrsqrt.f32 %v2003_v39  ;;  %v1983_v49 = vmul.f32 0.0078125, %v1937_v15  ;;  %3131 = vmatpush1.bf16.msra.mxu1 %v3130_v27  ;;  %v1935_v29 = vpop.xlane.xlu0 %1934  ;;  %v2170_v42 = vadd.f32 %v4714_v3, %v2124_v22 }
 0x48e   : > { %3422 = vrsqrt.f32 %v2002_v9  ;;  %v1982_v10 = vmul.f32 0.0078125, %v1935_v29  ;;  %3132 = vmatprep.subr.bf16.mxu1 %v4971_v56  ;;  %v2145_v7 = vmul.f32 %v4708_v23, %v2099_v47 }
 0x48f   : > { %v3413_v2 = vpop.eup %3412  ;;  %v2023_v30 = vadd.f32 1e-05, %v1983_v49  ;;  %v3103_v31 = vpack.c.bf16 %v2171_v62, %v2170_v42  ;;  %v2144_v13 = vmul.f32 %v4708_v23, %v2098_v18 }
 0x490   : > { %v3415_v17 = vpop.eup %3414  ;;  %v2081_v43 = vmul.f32 %v3413_v2, %v4576_v33  ;;  %v2022_v14 = vadd.f32 1e-05, %v1982_v10  ;;  %v1901_v4 = vpop.xlane.xlu1 %1900  ;;  %v2191_v59 = vadd.f32 %v4714_v3, %v2145_v7 }
 0x491   : > { %v2080_v20 = vmul.f32 %v3415_v17, %v4579_v11  ;;  %3424 = vrsqrt.f32 %v2023_v30  ;;  %v1965_v40 = vmul.f32 0.0078125, %v1901_v4  ;;  %3104 = vmatpush1.bf16.msra.mxu0 %v3103_v31  ;;  %v1899_v28 = vpop.xlane.xlu0 %1898  ;;  %v2190_v35 = vadd.f32 %v4714_v3, %v2144_v13 }
 0x492   : > { %3426 = vrsqrt.f32 %v2022_v14  ;;  %v1964_v16 = vmul.f32 0.0078125, %v1899_v28  ;;  %3105 = vmatprep.subr.bf16.mxu0 %v4971_v56  ;;  %v2127_v0 = vmul.f32 %v4708_v23, %v2081_v43 }
 0x493   : > { %v3417_v8 = vpop.eup %3416  ;;  %v2005_v33 = vadd.f32 1e-05, %v1965_v40  ;;  %v3133_v34 = vpack.c.bf16 %v2191_v59, %v2190_v35  ;;  %v2126_v37 = vmul.f32 %v4708_v23, %v2080_v20 }
 0x494   : > { %v3419_v58 = vpop.eup %3418  ;;  %v2101_v11 = vmul.f32 %v3417_v8, %v4588_v19  ;;  %v2004_v53 = vadd.f32 1e-05, %v1964_v16  ;;  %v1941_v45 = vpop.xlane.xlu1 %1940  ;;  %v2173_v60 = vadd.f32 %v4714_v3, %v2127_v0 }
 0x495   : > { %v2100_v12 = vmul.f32 %v3419_v58, %v4591_v38  ;;  %3428 = vrsqrt.f32 %v2005_v33  ;;  %v1985_v39 = vmul.f32 0.0078125, %v1941_v45  ;;  %3134 = vmatpush1.bf16.msra.mxu1 %v3133_v34  ;;  %v1939_v27 = vpop.xlane.xlu0 %1938  ;;  %v2172_v22 = vadd.f32 %v4714_v3, %v2126_v37 }
 0x496   : > { %3430 = vrsqrt.f32 %v2004_v53  ;;  %v1984_v54 = vmul.f32 0.0078125, %v1939_v27  ;;  %3135 = vmatprep.subr.bf16.mxu1 %v4971_v56  ;;  %v2147_v47 = vmul.f32 %v4708_v23, %v2101_v11  ;;  %v2393_v38 = vmul.f32 0.0078125, %v4471_v55 }
 0x497   : > { %v3421_v9 = vpop.eup %3420  ;;  %v2025_v19 = vadd.f32 1e-05, %v1985_v39  ;;  %v3106_v15 = vpack.c.bf16 %v2173_v60, %v2172_v22  ;;  %v2146_v62 = vmul.f32 %v4708_v23, %v2100_v12 }
 0x498   : > { %v3423_v18 = vpop.eup %3422  ;;  %v2083_v49 = vmul.f32 %v3421_v9, %v4598_v36  ;;  %v2024_v29 = vadd.f32 1e-05, %v1984_v54  ;;  %v1905_v42 = vpop.xlane.xlu1 %1904  ;;  %v2193_v10 = vadd.f32 %v4714_v3, %v2147_v47  ;;  %v2392_v36 = vmul.f32 0.0078125, %v4473_v44 }
 0x499   : > { %v2082_v7 = vmul.f32 %v3423_v18, %v4601_v6  ;;  %3432 = vrsqrt.f32 %v2025_v19  ;;  %v1967_v2 = vmul.f32 0.0078125, %v1905_v42  ;;  %3107 = vmatpush1.bf16.msra.mxu0 %v3106_v15  ;;  %v1903_v30 = vpop.xlane.xlu0 %1902  ;;  %v2192_v31 = vadd.f32 %v4714_v3, %v2146_v62 }
 0x49a   : > { %3434 = vrsqrt.f32 %v2024_v29  ;;  %v1966_v13 = vmul.f32 0.0078125, %v1903_v30  ;;  %3108 = vmatprep.subr.bf16.mxu0 %v4971_v56  ;;  %v2129_v55 = vmul.f32 %v4708_v23, %v2083_v49  ;;  %v2399_v59 = vadd.f32 1e-05, %v2393_v38 }
 0x49b   : > { %v3425_v17 = vpop.eup %3424  ;;  %v2007_v43 = vadd.f32 1e-05, %v1967_v2  ;;  %v3136_v14 = vpack.c.bf16 %v2193_v10, %v2192_v31  ;;  %v2128_v4 = vmul.f32 %v4708_v23, %v2082_v7 }
 0x49c   : > { %v3427_v6 = vpop.eup %3426  ;;  %v2103_v20 = vmul.f32 %v3425_v17, %v4608_v5  ;;  %v2006_v40 = vadd.f32 1e-05, %v1966_v13  ;;  %v1945_v28 = vpop.xlane.xlu1 %1944  ;;  %v2175_v35 = vadd.f32 %v4714_v3, %v2129_v55  ;;  %v2398_v5 = vadd.f32 1e-05, %v2392_v36 }
 0x49d   : > { %v2102_v16 = vmul.f32 %v3427_v6, %v4611_v57  ;;  %3436 = vrsqrt.f32 %v2007_v43  ;;  %v1987_v0 = vmul.f32 0.0078125, %v1945_v28  ;;  %3137 = vmatpush1.bf16.msra.mxu1 %v3136_v14  ;;  %v1943_v8 = vpop.xlane.xlu0 %1942  ;;  %v2174_v44 = vadd.f32 %v4714_v3, %v2128_v4 }
 0x49e   : > { %3438 = vrsqrt.f32 %v2006_v40  ;;  %v1986_v33 = vmul.f32 0.0078125, %v1943_v8  ;;  %3138 = vmatprep.subr.bf16.mxu1 %v4971_v56  ;;  %v2149_v34 = vmul.f32 %v4708_v23, %v2103_v20 }
 0x49f   : > { %v3429_v37 = vpop.eup %3428  ;;  %v2027_v58 = vadd.f32 1e-05, %v1987_v0  ;;  %v3109_v11 = vpack.c.bf16 %v2175_v35, %v2174_v44  ;;  %v2148_v53 = vmul.f32 %v4708_v23, %v2102_v16  ;;  %3440 = vrsqrt.f32 %v2399_v59 }
 0x4a0   : > { %v3431_v45 = vpop.eup %3430  ;;  %v2085_v57 = vmul.f32 %v3429_v37, %v4618_v24  ;;  %v2026_v60 = vadd.f32 1e-05, %v1986_v33  ;;  %v1909_v12 = vpop.xlane.xlu1 %1908  ;;  %v2195_v39 = vadd.f32 %v4714_v3, %v2149_v34 }
 0x4a1   : > { %v2084_v27 = vmul.f32 %v3431_v45, %v4621_v32  ;;  %3442 = vrsqrt.f32 %v2027_v58  ;;  %v1969_v22 = vmul.f32 0.0078125, %v1909_v12  ;;  %3110 = vmatpush1.bf16.msra.mxu0 %v3109_v11  ;;  %v1907_v54 = vpop.xlane.xlu0 %1906  ;;  %v2194_v47 = vadd.f32 %v4714_v3, %v2148_v53 }
 0x4a2   : > { %3444 = vrsqrt.f32 %v2026_v60  ;;  %v1968_v9 = vmul.f32 0.0078125, %v1907_v54  ;;  %3111 = vmatprep.subr.bf16.mxu0 %v4971_v56  ;;  %v2131_v19 = vmul.f32 %v4708_v23, %v2085_v57 }
 0x4a3   : > { %v3433_v15 = vpop.eup %3432  ;;  %v2009_v24 = vadd.f32 1e-05, %v1969_v22  ;;  %v3139_v62 = vpack.c.bf16 %v2195_v39, %v2194_v47  ;;  %v2130_v18 = vmul.f32 %v4708_v23, %v2084_v27  ;;  %3446 = vrsqrt.f32 %v2398_v5 }
 0x4a4   : > { %v3435_v38 = vpop.eup %3434  ;;  %v2105_v32 = vmul.f32 %v3433_v15, %v4628_v25  ;;  %v2008_v49 = vadd.f32 1e-05, %v1968_v9  ;;  %v1949_v29 = vpop.xlane.xlu1 %1948  ;;  %v2177_v42 = vadd.f32 %v4714_v3, %v2131_v19 }
 0x4a5   : > { %v2104_v10 = vmul.f32 %v3435_v38, %v4631_v41  ;;  %3448 = vrsqrt.f32 %v2009_v24  ;;  %v1989_v7 = vmul.f32 0.0078125, %v1949_v29  ;;  %3140 = vmatpush1.bf16.msra.mxu1 %v3139_v62  ;;  %v1947_v2 = vpop.xlane.xlu0 %1946  ;;  %v2176_v30 = vadd.f32 %v4714_v3, %v2130_v18 }
 0x4a6   : > { %3450 = vrsqrt.f32 %v2008_v49  ;;  %v1988_v31 = vmul.f32 0.0078125, %v1947_v2  ;;  %3141 = vmatprep.subr.bf16.mxu1 %v4971_v56  ;;  %v2151_v13 = vmul.f32 %v4708_v23, %v2105_v32 }
 0x4a7   : > { %v3437_v55 = vpop.eup %3436  ;;  %v2029_v25 = vadd.f32 1e-05, %v1989_v7  ;;  %v3112_v17 = vpack.c.bf16 %v2177_v42, %v2176_v30  ;;  %v2150_v36 = vmul.f32 %v4708_v23, %v2104_v10 }
 0x4a8   : > { %v3439_v43 = vpop.eup %3438  ;;  %v2087_v41 = vmul.f32 %v3437_v55, %v4638_v48  ;;  %v2028_v14 = vadd.f32 1e-05, %v1988_v31  ;;  %v2388_v4 = vpop.xlane.xlu1 %2387  ;;  %v2197_v6 = vadd.f32 %v4714_v3, %v2151_v13 }
 0x4a9   : > { %v2086_v59 = vmul.f32 %v3439_v43, %v4641_v63  ;;  %3452 = vrsqrt.f32 %v2029_v25  ;;  %v2396_v20 = vmul.f32 0.0078125, %v2388_v4  ;;  %3113 = vmatpush1.bf16.msra.mxu0 %v3112_v17  ;;  %v2386_v40 = vpop.xlane.xlu0 %2385  ;;  %v2196_v28 = vadd.f32 %v4714_v3, %v2150_v36  ;;  %v3441_v35 = vpop.eup %3440  ;;  %v4972_v25 = vld [vmem:[#allocation8_spill] sm:$0xff]  ;;  %v4973_v36 = vld [vmem:[#allocation9_spill] sm:$0xff] }
 0x4aa   : > { %3454 = vrsqrt.f32 %v2028_v14  ;;  %v2395_v16 = vmul.f32 0.0078125, %v2386_v40  ;;  %3114 = vmatprep.subr.bf16.mxu0 %v4971_v56  ;;  %v2133_v0 = vmul.f32 %v4708_v23, %v2087_v41  ;;  %v2411_v27 = vmul.f32 %v3441_v35, %v4271_v46  ;;  %v355_v41 = vld [vmem:[#allocation2] sm:$0x1f] }
 0x4ab   : > { %v3443_v48 = vpop.eup %3442  ;;  %v2402_v8 = vadd.f32 1e-05, %v2396_v20  ;;  %v3142_v44 = vpack.c.bf16 %v2197_v6, %v2196_v28  ;;  %v2132_v33 = vmul.f32 %v4708_v23, %v2086_v59 }
 0x4ac   : > { %v3445_v34 = vpop.eup %3444  ;;  %v2107_v63 = vmul.f32 %v3443_v48, %v4648_v50  ;;  %v2401_v37 = vadd.f32 1e-05, %v2395_v16  ;;  %v2391_v5 = vpop.xlane.xlu1 %2390  ;;  %v2179_v58 = vadd.f32 %v4714_v3, %v2133_v0  ;;  %v2417_v49 = vmul.f32 %v4708_v23, %v2411_v27  ;;  %v4974_v16 = vld [vmem:[#allocation10_spill] sm:$0xff] }
 0x4ad   : > { %v2106_v11 = vmul.f32 %v3445_v34, %v4651_v1  ;;  %3456 = vrsqrt.f32 %v2402_v8  ;;  %v2397_v53 = vmul.f32 0.0078125, %v2391_v5  ;;  %3143 = vmatpush1.bf16.msra.mxu1 %v3142_v44  ;;  %v2384_v45 = vpop.xlane.xlu0 %2383  ;;  %v2178_v57 = vadd.f32 %v4714_v3, %v2132_v33  ;;  %v3447_v60 = vpop.eup %3446  ;;  %v4975_v8 = vld [vmem:[#allocation11_spill] sm:$0xff] }
 0x4ae   : > { %3458 = vrsqrt.f32 %v2401_v37  ;;  %v2394_v12 = vmul.f32 0.0078125, %v2384_v45  ;;  %3144 = vmatprep.subr.bf16.mxu1 %v4971_v56  ;;  %v2153_v39 = vmul.f32 %v4708_v23, %v2107_v63  ;;  %v2410_v24 = vmul.f32 %v3447_v60, %v4261_v51 }
 0x4af   : > { %v3449_v50 = vpop.eup %3448  ;;  %v2403_v22 = vadd.f32 1e-05, %v2397_v53  ;;  %v3115_v54 = vpack.c.bf16 %v2179_v58, %v2178_v57  ;;  %v2152_v1 = vmul.f32 %v4708_v23, %v2106_v11  ;;  %v2423_v55 = vadd.f32 %v4714_v3, %v2417_v49  ;;  %v357_v11 = vld [vmem:[%s320_s19] sm:$0x1]  ;;  %v358_v53 = vld [vmem:[%s320_s19 + $0x1] sm:$0x1] }
 0x4b0   : > { %v3451_v47 = vpop.eup %3450  ;;  %v2089_v9 = vmul.f32 %v3449_v50, %v4658_v61  ;;  %v2400_v19 = vadd.f32 1e-05, %v2394_v12  ;;  %v2199_v15 = vadd.f32 %v4714_v3, %v2153_v39  ;;  %v2416_v7 = vmul.f32 %v4708_v23, %v2410_v24  ;;  %s3602_s19 = smov [#allocation5]  }
 0x4b1   : > { %v2088_v62 = vmul.f32 %v3451_v47, %v4661_v26  ;;  %3460 = vrsqrt.f32 %v2403_v22  ;;  %3116 = vmatpush1.bf16.msra.mxu0 %v3115_v54  ;;  %v2198_v18 = vadd.f32 %v4714_v3, %v2152_v1  ;;  %v3600_v34 = vmov 0.0   ;;  %s3534_s20 = sshll.u32 %s3602_s19, 4  ;;  %s3535_s20 = int_to_ptr.vmem [resolvable:$false] %s3534_s20 }
 0x4b2   : > { %3462 = vrsqrt.f32 %v2400_v19  ;;  %3117 = vmatprep.subr.bf16.mxu0 %v4971_v56  ;;  %v2135_v46 = vmul.f32 %v4708_v23, %v2089_v9  ;;  %v2422_v4 = vadd.f32 %v4714_v3, %v2416_v7  ;;  %s3536_s21 = scalar_lea.vmem %s3535_s20, 64  ;;  %p3537_p2 = scmp.lt.s32.totalorder %s4899_s9, %s3535_s20 }
 0x4b3   : > { %v3453_v38 = vpop.eup %3452  ;;  %v3145_v32 = vpack.c.bf16 %v2199_v15, %v2198_v18  ;;  %v2134_v61 = vmul.f32 %v4708_v23, %v2088_v62  ;;  %p3538_p3 = scmp.lt.s32.totalorder %s3536_s21, %s3530_s13 }
 0x4b4   : > { %v3455_v29 = vpop.eup %3454  ;;  %v2109_v51 = vmul.f32 %v3453_v38, %v4672_v21  ;;  %v2181_v26 = vadd.f32 %v4714_v3, %v2135_v46  ;;  %v3151_v40 = vpack.c.bf16 %v2423_v55, %v2422_v4 }
 0x4b5   : > { %v2108_v42 = vmul.f32 %v3455_v29, %v4675_v52  ;;  %3146 = vmatpush1.bf16.msra.mxu1 %v3145_v32  ;;  %v2180_v10 = vadd.f32 %v4714_v3, %v2134_v61  ;;  %p3539_p4 = por %p3538_p3, %p3537_p2 }
 0x4b6   : > { %3147 = vmatprep.subr.bf16.mxu1 %v4971_v56  ;;  %v2155_v2 = vmul.f32 %v4708_v23, %v2109_v51 }
 0x4b7   : > { %v3457_v30 = vpop.eup %3456  ;;  %v3118_v31 = vpack.c.bf16 %v2181_v26, %v2180_v10  ;;  %v2154_v13 = vmul.f32 %v4708_v23, %v2108_v42  ;;  %p3540_p7 = pnand %p3539_p4, %p3533_p12 }
 0x4b8   : > { %v3459_v21 = vpop.eup %3458  ;;  %v2414_v17 = vmul.f32 %v3457_v30, %v4972_v25  ;;  %v2201_v52 = vadd.f32 %v4714_v3, %v2155_v2 }
 0x4b9   : > { %v2413_v43 = vmul.f32 %v3459_v21, %v4973_v36  ;;  %3119 = vmatpush1.bf16.msra.mxu0 %v3118_v31  ;;  %v2200_v14 = vadd.f32 %v4714_v3, %v2154_v13 }
 0x4ba   : > { %3150 = vmatprep.subr.bf16.mxu0 %v4971_v56  ;;  %v2420_v6 = vmul.f32 %v4708_v23, %v2414_v17 }
 0x4bb   : > { %v3461_v59 = vpop.eup %3460  ;;  %v3148_v20 = vpack.c.bf16 %v2201_v52, %v2200_v14  ;;  %v2419_v28 = vmul.f32 %v4708_v23, %v2413_v43 }
 0x4bc   : > { %v3463_v35 = vpop.eup %3462  ;;  %v2415_v0 = vmul.f32 %v3461_v59, %v4974_v16  ;;  %2271 = vmatmul.mubr.f32.vlgmr.msra.gmra.mrb[40].mxu0 %v355_v41  ;;  %v2426_v48 = vadd.f32 %v4714_v3, %v2420_v6 }
 0x4bd   : > { %v2412_v44 = vmul.f32 %v3463_v35, %v4975_v8  ;;  %3149 = vmatpush1.bf16.msra.mxu1 %v3148_v20  ;;  %3152 = vmatpush3.bf16.msra.mxu0 %v3151_v40  ;;  %v2425_v33 = vadd.f32 %v4714_v3, %v2419_v28 }
 0x4be   : > { %3153 = vmatprep.subr.bf16.mxu1 %v4971_v56  ;;  %3060 = vmatprep.subr.mxu0 %v3600_v34  ;;  %v2421_v5 = vmul.f32 %v4708_v23, %v2415_v0 }
 0x4bf   : > { %v3154_v63 = vpack.c.bf16 %v2426_v48, %v2425_v33  ;;  %v2418_v37 = vmul.f32 %v4708_v23, %v2412_v44  ;;  %3062 = vmatprep.mubr.msk.f32.mxu0 %vm3601_vm3, %v3600_v34 }
 0x4c0   : > { %2341 = vmatmul.mubr.f32.vlgmr.msra.gmra.mrb[40].mxu1 %v355_v41  ;;  %v2427_v56 = vadd.f32 %v4714_v3, %v2421_v5 }
 0x4c1   : > { %3155 = vmatpush3.bf16.msra.mxu1 %v3154_v63  ;;  %v2424_v58 = vadd.f32 %v4714_v3, %v2418_v37  ;;  %3071 = vmatprep.mubr.msk.f32.mxu1 %vm3601_vm3, %v3600_v34 }
 0x4c2   : > { %3069 = vmatprep.subr.mxu1 %v3600_v34 }
 0x4c3   : > { %3061 = vmatpush3.msk.msra.mxu0 %vm1232_vm1, %v2424_v58 }
 0x4c4   : > { %3063 = vmatmul.mubr.msk.f32.vlgmr.msra.gmra.mrb[42].mxu0 %vm731_vm0, %v357_v11 }
 0x4c5   : > { %3070 = vmatpush3.msk.msra.mxu1 %vm1232_vm1, %v2427_v56 }
 0x4c6   : > { %3072 = vmatmul.mubr.msk.f32.vlgmr.msra.gmra.mrb[42].mxu1 %vm731_vm0, %v358_v53 }
 0x58f   : > { %v2272_v45 = vpop.f32.mrb[40].mxu0 }
 0x590   : > { %v2580_v23 = vmul.f32 %v2272_v45, %v2272_v45  ;;  %v2274_v57 = vpop.f32.mrb[41].mxu0 }
 0x592   : > { %v2583_v60 = vsel %vm2582_vm4, %v2580_v23, 0.0 }
 0x593   : > { %2584 = vadd.xlane.f32.xlu0 %v2583_v60  ;;  %v2342_v12 = vpop.f32.mrb[40].mxu1 }
 0x594   : > { %v2344_v39 = vpop.f32.mrb[41].mxu1  ;;  %v2581_v54 = vmul.f32 %v2342_v12, %v2342_v12 }
 0x596   : > { %v2586_v15 = vsel %vm2582_vm4, %v2581_v54, 0.0 }
 0x597   : > { %v2500_v50 = vpop.f32.mrb[42].mxu0 }
 0x598   : > { %v2597_v27 = vmul.f32 %v2500_v50, %v2500_v50  ;;  %v3064_v22 = vpop.f32.mrb[43].mxu0 }
 0x599   : > { %v2576_v3 = vpop.f32.mrb[42].mxu1 }
 0x59a   : > { %v2598_v1 = vmul.f32 %v2576_v3, %v2576_v3  ;;  %v3073_v47 = vpop.f32.mrb[43].mxu1  ;;  %v2599_v9 = vsel %vm1232_vm1, %v2597_v27, 0.0 }
 0x59b   : > { %2600 = vadd.xlane.f32.xlu1 %v2599_v9 }
 0x59c   : > { %v2602_v19 = vsel %vm1232_vm1, %v2598_v1, 0.0 }
 0x59d   : > { %2603 = vadd.xlane.f32.xlu0 %v2602_v19 }
 0x59f   : > { %2587 = vadd.xlane.f32.xlu1 %v2586_v15 }
 0x620   : > { %v2585_v24 = vpop.xlane.xlu0 %2584 }
 0x621   : > { %v2589_v62 = vmax.f32 %v2585_v24, 1e-24 }
 0x623   : > { %3464 = vrsqrt.f32 %v2589_v62 }
 0x628   : > { %v2601_v18 = vpop.xlane.xlu1 %2600 }
 0x629   : > { %v2605_v46 = vmax.f32 %v2601_v18, 1e-24 }
 0x62a   : > { %v2604_v38 = vpop.xlane.xlu0 %2603 }
 0x62b   : > { %3466 = vrsqrt.f32 %v2605_v46  ;;  %v2606_v32 = vmax.f32 %v2604_v38, 1e-24 }
 0x62c   : > { %v2588_v61 = vpop.xlane.xlu1 %2587 }
 0x62d   : > { %v3465_v49 = vpop.eup %3464  ;;  %3468 = vrsqrt.f32 %v2606_v32  ;;  %v2590_v29 = vmax.f32 %v2588_v61, 1e-24 }
 0x62e   : > { %v2593_v51 = vmul.f32 %v3465_v49, %v2272_v45 }
 0x62f   : > { %3470 = vrsqrt.f32 %v2590_v29 }
 0x630   : > { %2595 = vst [vmem:[%s4889_s23] sm:$0x1f] %v2593_v51 }
 0x635   : > { %v3467_v26 = vpop.eup %3466 }
 0x636   : > { %v2609_v42 = vmul.f32 %v3467_v26, %v2500_v50 }
 0x637   : > { %v3469_v10 = vpop.eup %3468 }
 0x638   : > { %v2610_v7 = vmul.f32 %v3469_v10, %v2576_v3  ;;  %2611 = vst [vmem:[%s302_s14] sm:$0x1] %v2609_v42 }
 0x639   : > { %v3471_v2 = vpop.eup %3470 }
 0x63a   : > { %v2594_v30 = vmul.f32 %v3471_v2, %v2342_v12  ;;  %2612 = vst [vmem:[%s302_s14 + $0x1] sm:$0x1] %v2610_v7 }
 0x63b   : > { %3543 = shalt.err (!%p3540_p7)
}
 0x63c   : > { %s3544_s22 = scalar_lea.hbm %s4897_s18, 32  ;;  %s3548_s15 = scalar_lea.hbm %s4949_s6, 64 }
 0x63d   : > { %p3545_p8 = scmp.ne.s32.totalorder %s4897_s18, %s3544_s22  ;;  %p3549_p1 = scmp.lt.u32.totalorder %s4897_s18, %s4949_s6 }
 0x63e   : > { %p3550_p0 = scmp.lt.u32.totalorder %s3548_s15, %s3544_s22  ;;  %p3552_p5 = scmp.lt.u32.totalorder %s3544_s22, %s4897_s18 }
 0x63f   : > { %p3546_p11 = pnand %p3545_p8, %p4976_p9 }
 0x640   : > { %p3551_p6 = por %p3550_p0, %p3549_p1 }
 0x641   : > { %p3547_p13 = pneg %p3546_p11 }
 0x642   : > { %p3553_p10 = por %p3552_p5, %p3551_p6 }
 0x644   : > { %p3554_p12 = pnand %p3553_p10, %p3547_p13 }
 0x646   : > { %3557 = shalt.err (!%p3554_p12)
}
 0x647   : > { %s3603_s17 = smov 16   ;;  %s3604_s13 = smov 1   ;;  %2596 = vst [vmem:[%s4889_s23 + $0x8] sm:$0x1f] %v2594_v30 }
 0x648   : > { %3161 = dma.vmem_to_hbm [thread:$0]  (%p4976_p9), %s4899_s9, 32, %s4897_s18, %s4901_s28, %s3603_s17, %s3603_s17, %s3604_s13  }
 0x649 PF: > { %p3173_p2 = scmp.ge.s32.totalorder %s3596_s27, 2  ;;  %s2651_s19 = sand.u32 1, %s3584_s24  }
 0x64a   : > { %p4977_p3 = scmp.ne.s32.totalorder %s4961_s12, 0  ;;  %s2652_s20 = scalar_lea.sflag [#allocation4], %s2651_s19 }
 0x64c   : > { %p3168_p4 = pnand %p3173_p2, %p4977_p3 }
 0x64e   : > { %3579 = dma.done.wait (!%p3168_p4), %s2652_s20, 32  }
 0x64f   : > { %3581 = vsyncadd (!%p3168_p4), %s2652_s20, 4294967264  ;;  %p19_p7 = scmp.ge.s32.totalorder %s3670_s30, 4   ;;  %s4978_s24 = smov %s3588_s25 }
 0x650   : > { %s4979_s25 = smov %s3592_s26  ;;  %s4980_s26 = smov %s3681_s10 }
 0x651   : > { %s4981_s27 = smov %s3670_s30  ;;  %21 = sbr.rel (!%p19_p7) target bundleno = 4 (0x4), region = 99 }
 0x658   :  { %2665 = vsyncpa [#allocation3], 1 }
 0x659   :  { %2667 = vsyncpa [#allocation3 + $0x1], 1 }
 0x65a   :  { %2668 = vsyncpa [#allocation4], 1 }
 0x65b   :  { %2670 = vsyncpa [#allocation4 + $0x1], 1 }

</bundles_post_ra>
